<compile_context>
chip_gen: v6e
topology: v6e:2x2x1
jax: 0.10.0
libtpu: 0.0.40
codegen_flags: <defaults>
</compile_context>

<pallas_src>
import math

import jax
import jax.numpy as jnp
from jax.experimental import pallas as pl
from jax.experimental.pallas import tpu as pltpu

BASE_WIDTH = 150
NUM_CLASSES = 10
IN_WIDTH = 3 * 32 * 32  # 3072
OUT_PAD = 128           # lane-dense padded output width (>= NUM_CLASSES)


def _round_up(n, m):
    return ((n + m - 1) // m) * m


def _cdiv(a, b):
    return -(-a // b)


def _mlp_kernel(x_ref, w1_ref, b1_ref, w2_ref, b2_ref, w3_ref, b3_ref,
                wf_ref, bf_ref, o_ref):
    # One batch tile per grid step.  Weights/biases have constant index_maps so
    # Pallas keeps them resident in VMEM across the whole grid.  x arrives in
    # f32 (no HBM round-trip for a wrapper cast) and is cast to bf16 here,
    # immediately before the MXU dot.  Accumulation is f32; bias add / ReLU run
    # on the VPU in f32.
    x_bf = x_ref[...].astype(jnp.bfloat16)
    h = jnp.dot(x_bf, w1_ref[...],
                preferred_element_type=jnp.float32) + b1_ref[...]
    h = jnp.maximum(h, 0.0).astype(jnp.bfloat16)
    h = jnp.dot(h, w2_ref[...],
                preferred_element_type=jnp.float32) + b2_ref[...]
    h = jnp.maximum(h, 0.0).astype(jnp.bfloat16)
    h = jnp.dot(h, w3_ref[...],
                preferred_element_type=jnp.float32) + b3_ref[...]
    h = jnp.maximum(h, 0.0).astype(jnp.bfloat16)
    out = jnp.dot(h, wf_ref[...],
                  preferred_element_type=jnp.float32) + bf_ref[...]
    o_ref[...] = out.astype(o_ref.dtype)


def prepare_params(params):
    """One-time parameter prep, hoisted out of the per-call path:
       bf16 casts of the matmul weights and lane-dense zero-padding of the
       final layer from 10 to OUT_PAD(=128) output columns."""
    (w1, b1, w2, b2, w3, b3, wf, bf) = params
    wf_pad = jnp.zeros((BASE_WIDTH, OUT_PAD), jnp.bfloat16)
    wf_pad = wf_pad.at[:, :NUM_CLASSES].set(wf.astype(jnp.bfloat16))
    bf_pad = jnp.zeros((1, OUT_PAD), jnp.float32)
    bf_pad = bf_pad.at[:, :NUM_CLASSES].set(bf.astype(jnp.float32))
    return (w1.astype(jnp.bfloat16), b1.astype(jnp.float32),
            w2.astype(jnp.bfloat16), b2.astype(jnp.float32),
            w3.astype(jnp.bfloat16), b3.astype(jnp.float32),
            wf_pad, bf_pad)


def _choose_tiling(b, batch_tile):
    """Pick (tb, ntiles) so that:
       * tb is a multiple of 8 (sublane alignment),
       * batch padding waste is bounded to < 8 rows per tile (not up to tb-1),
       * the grid has >= 2 steps whenever the batch allows it, so both
         TensorCores get work on v7x (batch axis is marked "parallel")."""
    b8 = _round_up(max(b, 1), 8)
    ntiles = max(1, _cdiv(b8, batch_tile))
    if ntiles == 1 and b8 >= 16:
        ntiles = 2
    tb = _round_up(_cdiv(b8, ntiles), 8)
    return tb, ntiles


def mlp_forward(x, prepped_params, *, batch_tile=512):
    """x: (B, 3, 32, 32) float32 NCHW.  prepped_params: prepare_params(...).
       Returns (B, NUM_CLASSES) float32."""
    b = x.shape[0]
    x_flat = x.reshape(b, -1)  # (B, 3072), matches PyTorch reshape

    (w1b, b1, w2b, b2, w3b, b3, wf_pad, bf_pad) = prepped_params

    tb, ntiles = _choose_tiling(b, batch_tile)
    b_pad = tb * ntiles
    if b_pad != b:
        x_flat = jnp.pad(x_flat, ((0, b_pad - b), (0, 0)))
    grid = (ntiles,)

    def _const_spec(shape):
        # Constant block index -> resident in VMEM, never re-DMA'd.
        return pl.BlockSpec(shape, lambda i: (0, 0))

    in_specs = [
        pl.BlockSpec((tb, IN_WIDTH), lambda i: (i, 0)),  # x tile (f32 stream)
        _const_spec((IN_WIDTH, BASE_WIDTH)),             # w1 (resident)
        _const_spec((1, BASE_WIDTH)),                    # b1
        _const_spec((BASE_WIDTH, BASE_WIDTH)),           # w2
        _const_spec((1, BASE_WIDTH)),                    # b2
        _const_spec((BASE_WIDTH, BASE_WIDTH)),           # w3
        _const_spec((1, BASE_WIDTH)),                    # b3
        _const_spec((BASE_WIDTH, OUT_PAD)),              # wf (lane-padded)
        _const_spec((1, OUT_PAD)),                       # bf (lane-padded)
    ]
    out_spec = pl.BlockSpec((tb, OUT_PAD), lambda i: (i, 0))

    # Cost estimate reflects the work the kernel actually does (incl. the
    # 128-wide padded head).
    flops = 2 * b_pad * (IN_WIDTH * BASE_WIDTH
                         + 2 * BASE_WIDTH * BASE_WIDTH
                         + BASE_WIDTH * OUT_PAD)
    bytes_accessed = (x_flat.size * 4                                # f32 x
                      + (w1b.size + w2b.size + w3b.size + wf_pad.size) * 2
                      + (b1.size + b2.size + b3.size + bf_pad.size) * 4
                      + b_pad * OUT_PAD * 4)                         # f32 out

    out_padded = pl.pallas_call(
        _mlp_kernel,
        out_shape=jax.ShapeDtypeStruct((b_pad, OUT_PAD), jnp.float32),
        grid=grid,
        in_specs=in_specs,
        out_specs=out_spec,
        compiler_params=pltpu.CompilerParams(
            # TODO(synk): on v7x, pltpu.CORE_PARALLEL on the batch axis may
            # give true 2-TC sharding; "parallel" is the portable choice.
            dimension_semantics=("parallel",),
            # f32 x tile (tb x 3072) double-buffered (12 MiB at tb=512) plus
            # resident weights/output buffers: give Mosaic headroom above the
            # 16/32 MiB default scoped VMEM limits while staying well under
            # v7x's 64 MiB physical VMEM.
            vmem_limit_bytes=48 << 20),
        cost_estimate=pl.CostEstimate(
            flops=flops, transcendentals=0, bytes_accessed=bytes_accessed),
    )(x_flat, w1b, b1, w2b, b2, w3b, b3, wf_pad, bf_pad)

    return out_padded[:b, :NUM_CLASSES]


def init_params(key):
    """Deterministic init matching PyTorch nn.Linear default:
       U(-1/sqrt(fan_in), 1/sqrt(fan_in)) for both weights and biases.
       Weights stored as (in_features, out_features)."""
    dims = [(IN_WIDTH, BASE_WIDTH),
            (BASE_WIDTH, BASE_WIDTH),
            (BASE_WIDTH, BASE_WIDTH),
            (BASE_WIDTH, NUM_CLASSES)]
    params = []
    for (fan_in, fan_out) in dims:
        key, kw, kb = jax.random.split(key, 3)
        bound = 1.0 / math.sqrt(fan_in)
        w = jax.random.uniform(kw, (fan_in, fan_out), jnp.float32, -bound, bound)
        bias = jax.random.uniform(kb, (1, fan_out), jnp.float32, -bound, bound)
        params.extend([w, bias])
    return tuple(params)


def reference_forward(x, params):
    """Pure-JAX f32 reference matching the PyTorch module."""
    (w1, b1, w2, b2, w3, b3, wf, bf) = params
    h = x.reshape(x.shape[0], -1)
    h = jnp.maximum(h @ w1 + b1, 0.0)
    h = jnp.maximum(h @ w2 + b2, 0.0)
    h = jnp.maximum(h @ w3 + b3, 0.0)
    return h @ wf + bf


if __name__ == "__main__":
    key = jax.random.PRNGKey(0)
    key, kx = jax.random.split(key)
    x = jax.random.normal(kx, (2, 3, 32, 32), jnp.float32)

    params = init_params(key)
    prepped = prepare_params(params)          # one-time param prep

    out = mlp_forward(x, prepped)
    out = jax.block_until_ready(out)

    ref = reference_forward(x, params)
    assert out.shape == (2, NUM_CLASSES)
    # Loosened tolerance vs the f32 reference: matmul operands are bf16
    # (accumulation stays f32).
    assert jnp.allclose(out, ref, atol=3e-2, rtol=3e-2), (
        f"max abs diff {jnp.max(jnp.abs(out - ref))}")

    print("KERNEL_OK")
</pallas_src>

<mosaic_0001>
module attributes {stable_mosaic.version = 11 : i64} {
  func.func @_mlp_kernel(%arg0: i32, %arg1: memref<8x3072xf32, #tpu.memory_space<vmem>>, %arg2: memref<3072x150xbf16, #tpu.memory_space<vmem>>, %arg3: memref<1x150xf32, #tpu.memory_space<vmem>>, %arg4: memref<150x150xbf16, #tpu.memory_space<vmem>>, %arg5: memref<1x150xf32, #tpu.memory_space<vmem>>, %arg6: memref<150x150xbf16, #tpu.memory_space<vmem>>, %arg7: memref<1x150xf32, #tpu.memory_space<vmem>>, %arg8: memref<150x128xbf16, #tpu.memory_space<vmem>>, %arg9: memref<1x128xf32, #tpu.memory_space<vmem>>, %arg10: memref<8x128xf32, #tpu.memory_space<vmem>>) attributes {dimension_semantics = [#tpu.dimension_semantics<parallel>], iteration_bounds = array<i64: 1>, scalar_prefetch = 0 : i64, scratch_operands = 0 : i64, tpu.core_type = #tpu.core_type<tc>, window_params = [{transform_indices = @transform_0, window_bounds = array<i64: 8, 3072>}, {pipeline_mode = #tpu.pipeline_mode<synchronous>, transform_indices = @transform_1, window_bounds = array<i64: 3072, 150>}, {pipeline_mode = #tpu.pipeline_mode<synchronous>, transform_indices = @transform_2, window_bounds = array<i64: 1, 150>}, {pipeline_mode = #tpu.pipeline_mode<synchronous>, transform_indices = @transform_3, window_bounds = array<i64: 150, 150>}, {pipeline_mode = #tpu.pipeline_mode<synchronous>, transform_indices = @transform_4, window_bounds = array<i64: 1, 150>}, {pipeline_mode = #tpu.pipeline_mode<synchronous>, transform_indices = @transform_5, window_bounds = array<i64: 150, 150>}, {pipeline_mode = #tpu.pipeline_mode<synchronous>, transform_indices = @transform_6, window_bounds = array<i64: 1, 150>}, {pipeline_mode = #tpu.pipeline_mode<synchronous>, transform_indices = @transform_7, window_bounds = array<i64: 150, 128>}, {pipeline_mode = #tpu.pipeline_mode<synchronous>, transform_indices = @transform_8, window_bounds = array<i64: 1, 128>}, {transform_indices = @transform_9, window_bounds = array<i64: 8, 128>}]} {
    %c0 = arith.constant 0 : index
    %c0_0 = arith.constant 0 : index
    %0 = vector.load %arg1[%c0, %c0_0] : memref<8x3072xf32, #tpu.memory_space<vmem>>, vector<8x3072xf32>
    %1 = arith.truncf %0 : vector<8x3072xf32> to vector<8x3072xbf16>
    %c0_1 = arith.constant 0 : index
    %c0_2 = arith.constant 0 : index
    %2 = vector.load %arg2[%c0_1, %c0_2] : memref<3072x150xbf16, #tpu.memory_space<vmem>>, vector<3072x150xbf16>
    %cst = arith.constant dense<0.000000e+00> : vector<8x150xf32>
    %3 = tpu.matmul %1, %2, %cst {dimension_numbers = #tpu.dot_dimension_numbers<[1], [0], [0], [1], [0, 0, 1, 1], [], []>} : vector<8x3072xbf16>, vector<3072x150xbf16>, vector<8x150xf32> -> vector<8x150xf32>
    %c0_3 = arith.constant 0 : index
    %c0_4 = arith.constant 0 : index
    %4 = vector.load %arg3[%c0_3, %c0_4] : memref<1x150xf32, #tpu.memory_space<vmem>>, vector<1x150xf32>
    %5 = vector.broadcast %4 : vector<1x150xf32> to vector<8x150xf32>
    %6 = arith.addf %3, %5 : vector<8x150xf32>
    %cst_5 = arith.constant 0.000000e+00 : f32
    %7 = vector.broadcast %cst_5 : f32 to vector<8x150xf32>
    %8 = arith.maximumf %6, %7 : vector<8x150xf32>
    %9 = arith.truncf %8 : vector<8x150xf32> to vector<8x150xbf16>
    %c0_6 = arith.constant 0 : index
    %c0_7 = arith.constant 0 : index
    %10 = vector.load %arg4[%c0_6, %c0_7] : memref<150x150xbf16, #tpu.memory_space<vmem>>, vector<150x150xbf16>
    %cst_8 = arith.constant dense<0.000000e+00> : vector<8x150xf32>
    %11 = tpu.matmul %9, %10, %cst_8 {dimension_numbers = #tpu.dot_dimension_numbers<[1], [0], [0], [1], [0, 0, 1, 1], [], []>} : vector<8x150xbf16>, vector<150x150xbf16>, vector<8x150xf32> -> vector<8x150xf32>
    %c0_9 = arith.constant 0 : index
    %c0_10 = arith.constant 0 : index
    %12 = vector.load %arg5[%c0_9, %c0_10] : memref<1x150xf32, #tpu.memory_space<vmem>>, vector<1x150xf32>
    %13 = vector.broadcast %12 : vector<1x150xf32> to vector<8x150xf32>
    %14 = arith.addf %11, %13 : vector<8x150xf32>
    %cst_11 = arith.constant 0.000000e+00 : f32
    %15 = vector.broadcast %cst_11 : f32 to vector<8x150xf32>
    %16 = arith.maximumf %14, %15 : vector<8x150xf32>
    %17 = arith.truncf %16 : vector<8x150xf32> to vector<8x150xbf16>
    %c0_12 = arith.constant 0 : index
    %c0_13 = arith.constant 0 : index
    %18 = vector.load %arg6[%c0_12, %c0_13] : memref<150x150xbf16, #tpu.memory_space<vmem>>, vector<150x150xbf16>
    %cst_14 = arith.constant dense<0.000000e+00> : vector<8x150xf32>
    %19 = tpu.matmul %17, %18, %cst_14 {dimension_numbers = #tpu.dot_dimension_numbers<[1], [0], [0], [1], [0, 0, 1, 1], [], []>} : vector<8x150xbf16>, vector<150x150xbf16>, vector<8x150xf32> -> vector<8x150xf32>
    %c0_15 = arith.constant 0 : index
    %c0_16 = arith.constant 0 : index
    %20 = vector.load %arg7[%c0_15, %c0_16] : memref<1x150xf32, #tpu.memory_space<vmem>>, vector<1x150xf32>
    %21 = vector.broadcast %20 : vector<1x150xf32> to vector<8x150xf32>
    %22 = arith.addf %19, %21 : vector<8x150xf32>
    %cst_17 = arith.constant 0.000000e+00 : f32
    %23 = vector.broadcast %cst_17 : f32 to vector<8x150xf32>
    %24 = arith.maximumf %22, %23 : vector<8x150xf32>
    %25 = arith.truncf %24 : vector<8x150xf32> to vector<8x150xbf16>
    %c0_18 = arith.constant 0 : index
    %c0_19 = arith.constant 0 : index
    %26 = vector.load %arg8[%c0_18, %c0_19] : memref<150x128xbf16, #tpu.memory_space<vmem>>, vector<150x128xbf16>
    %cst_20 = arith.constant dense<0.000000e+00> : vector<8x128xf32>
    %27 = tpu.matmul %25, %26, %cst_20 {dimension_numbers = #tpu.dot_dimension_numbers<[1], [0], [0], [1], [0, 0, 1, 1], [], []>} : vector<8x150xbf16>, vector<150x128xbf16>, vector<8x128xf32> -> vector<8x128xf32>
    %c0_21 = arith.constant 0 : index
    %c0_22 = arith.constant 0 : index
    %28 = vector.load %arg9[%c0_21, %c0_22] : memref<1x128xf32, #tpu.memory_space<vmem>>, vector<1x128xf32>
    %29 = vector.broadcast %28 : vector<1x128xf32> to vector<8x128xf32>
    %30 = arith.addf %27, %29 : vector<8x128xf32>
    %c0_23 = arith.constant 0 : index
    %c0_24 = arith.constant 0 : index
    %31 = vector.load %arg10[%c0_23, %c0_24] : memref<8x128xf32, #tpu.memory_space<vmem>>, vector<8x128xf32>
    tpu.vector_store %arg10[%c0_23, %c0_24], %30 {strides = array<i32>} : memref<8x128xf32, #tpu.memory_space<vmem>>, vector<8x128xf32>,
    return
  }
  func.func @transform_0(%arg0: i32) -> (i32, i32) {
    %c0_i32 = arith.constant 0 : i32
    %c0_i32_0 = arith.constant 0 : i32
    return %arg0, %c0_i32 : i32, i32
  }
  func.func @transform_1(%arg0: i32) -> (i32, i32) {
    %c0_i32 = arith.constant 0 : i32
    %c0_i32_0 = arith.constant 0 : i32
    %c0_i32_1 = arith.constant 0 : i32
    return %c0_i32, %c0_i32_0 : i32, i32
  }
  func.func @transform_2(%arg0: i32) -> (i32, i32) {
    %c0_i32 = arith.constant 0 : i32
    %c0_i32_0 = arith.constant 0 : i32
    %c0_i32_1 = arith.constant 0 : i32
    return %c0_i32, %c0_i32_0 : i32, i32
  }
  func.func @transform_3(%arg0: i32) -> (i32, i32) {
    %c0_i32 = arith.constant 0 : i32
    %c0_i32_0 = arith.constant 0 : i32
    %c0_i32_1 = arith.constant 0 : i32
    return %c0_i32, %c0_i32_0 : i32, i32
  }
  func.func @transform_4(%arg0: i32) -> (i32, i32) {
    %c0_i32 = arith.constant 0 : i32
    %c0_i32_0 = arith.constant 0 : i32
    %c0_i32_1 = arith.constant 0 : i32
    return %c0_i32, %c0_i32_0 : i32, i32
  }
  func.func @transform_5(%arg0: i32) -> (i32, i32) {
    %c0_i32 = arith.constant 0 : i32
    %c0_i32_0 = arith.constant 0 : i32
    %c0_i32_1 = arith.constant 0 : i32
    return %c0_i32, %c0_i32_0 : i32, i32
  }
  func.func @transform_6(%arg0: i32) -> (i32, i32) {
    %c0_i32 = arith.constant 0 : i32
    %c0_i32_0 = arith.constant 0 : i32
    %c0_i32_1 = arith.constant 0 : i32
    return %c0_i32, %c0_i32_0 : i32, i32
  }
  func.func @transform_7(%arg0: i32) -> (i32, i32) {
    %c0_i32 = arith.constant 0 : i32
    %c0_i32_0 = arith.constant 0 : i32
    %c0_i32_1 = arith.constant 0 : i32
    return %c0_i32, %c0_i32_0 : i32, i32
  }
  func.func @transform_8(%arg0: i32) -> (i32, i32) {
    %c0_i32 = arith.constant 0 : i32
    %c0_i32_0 = arith.constant 0 : i32
    %c0_i32_1 = arith.constant 0 : i32
    return %c0_i32, %c0_i32_0 : i32, i32
  }
  func.func @transform_9(%arg0: i32) -> (i32, i32) {
    %c0_i32 = arith.constant 0 : i32
    %c0_i32_0 = arith.constant 0 : i32
    return %arg0, %c0_i32 : i32, i32
  }
}

</mosaic_0001>

<bundles_post_ra>
// kernel: tpu_custom_call.1
= control target key start
LH: loop header
LB: loop body
LE: loop exit
PB: predicated region body
PF: predicated region fallthrough
CT: control target
= control target key end

     0   :  { %s5973_s0 = inlined_call_operand.vmem [shape: f32[8,3072], index: 0, kind: input, shape index: {}]   ;;  %s5974_s1 = inlined_call_operand.vmem [shape: bf16[3072,150], index: 1, kind: input, shape index: {}]   ;;  %s5975_s2 = inlined_call_operand.vmem [shape: f32[1,150], index: 2, kind: input, shape index: {}]   ;;  %s5976_s3 = inlined_call_operand.vmem [shape: bf16[150,150], index: 3, kind: input, shape index: {}]   ;;  %s5977_s4 = inlined_call_operand.vmem [shape: f32[1,150], index: 4, kind: input, shape index: {}]   ;;  %s5978_s5 = inlined_call_operand.vmem [shape: bf16[150,150], index: 5, kind: input, shape index: {}]   ;;  %s5979_s6 = inlined_call_operand.vmem [shape: f32[1,150], index: 6, kind: input, shape index: {}]   ;;  %s5980_s7 = inlined_call_operand.vmem [shape: bf16[150,128], index: 7, kind: input, shape index: {}]   ;;  %s5981_s8 = inlined_call_operand.vmem [shape: f32[1,128], index: 8, kind: input, shape index: {}]   ;;  %s5982_s9 = inlined_call_operand.hbm [shape: f32[8,128], index: 9, kind: output, shape index: {}]  }
   0x1   :  { %v3842_v0 = vld [vmem:[%s5974_s1 + $0x74] ss:$8 sps:$4 sm:$0xff]   ;;  %v3846_v2 = vld [vmem:[%s5974_s1 + $0x70] ss:$8 sps:$4 sm:$0xff]   ;;  %v3848_v4 = vld [vmem:[%s5974_s1 + $0x64] ss:$8 sps:$4 sm:$0xff]  }
   0x2   :  { %v3844_v1 = vld [vmem:[%s5974_s1 + $0x174] ss:$8 sps:$4 sm:$0xff]   ;;  %2398 = vmatprep.subr.bf16.mxu0 %v3842_v0  ;;  %v3847_v3 = vld [vmem:[%s5974_s1 + $0x170] ss:$8 sps:$4 sm:$0xff]   ;;  %v3850_v5 = vld [vmem:[%s5974_s1 + $0x164] ss:$8 sps:$4 sm:$0xff]  }
   0x3   :  { %2439 = vmatprep.subr.bf16.mxu1 %v3844_v1  ;;  %2399 = vmatpush1.bf16.msra.mxu0 %v3846_v2  ;;  %v3852_v6 = vld [vmem:[%s5974_s1 + $0x60] ss:$8 sps:$4 sm:$0xff]   ;;  %v3854_v8 = vld [vmem:[%s5974_s1 + $0x54] ss:$8 sps:$4 sm:$0xff]   ;;  %v3858_v10 = vld [vmem:[%s5974_s1 + $0x50] ss:$8 sps:$4 sm:$0xff]  }
   0x4   :  { %2440 = vmatpush1.bf16.msra.mxu1 %v3847_v3  ;;  %2400 = vmatprep.subr.bf16.mxu0 %v3848_v4  ;;  %v3853_v7 = vld [vmem:[%s5974_s1 + $0x160] ss:$8 sps:$4 sm:$0xff]   ;;  %v3856_v9 = vld [vmem:[%s5974_s1 + $0x154] ss:$8 sps:$4 sm:$0xff]   ;;  %v3859_v11 = vld [vmem:[%s5974_s1 + $0x150] ss:$8 sps:$4 sm:$0xff]  }
   0x5   :  { %2441 = vmatprep.subr.bf16.mxu1 %v3850_v5  ;;  %v3860_v12 = vld [vmem:[%s5974_s1 + $0x44] ss:$8 sps:$4 sm:$0xff]   ;;  %v3864_v14 = vld [vmem:[%s5974_s1 + $0x40] ss:$8 sps:$4 sm:$0xff]   ;;  %v3866_v16 = vld [vmem:[%s5974_s1 + $0x34] ss:$8 sps:$4 sm:$0xff]  }
   0x6   :  { %v3862_v13 = vld [vmem:[%s5974_s1 + $0x144] ss:$8 sps:$4 sm:$0xff]   ;;  %v3865_v15 = vld [vmem:[%s5974_s1 + $0x140] ss:$8 sps:$4 sm:$0xff]   ;;  %v3868_v17 = vld [vmem:[%s5974_s1 + $0x134] ss:$8 sps:$4 sm:$0xff]  }
   0x7   :  { %2401 = vmatpush1.bf16.msra.mxu0 %v3852_v6  ;;  %v3870_v18 = vld [vmem:[%s5974_s1 + $0x30] ss:$8 sps:$4 sm:$0xff]   ;;  %v3872_v20 = vld [vmem:[%s5974_s1 + $0x24] ss:$8 sps:$4 sm:$0xff]   ;;  %v3876_v22 = vld [vmem:[%s5974_s1 + $0x20] ss:$8 sps:$4 sm:$0xff]  }
   0x8   :  { %2442 = vmatpush1.bf16.msra.mxu1 %v3853_v7  ;;  %2402 = vmatprep.subr.bf16.mxu0 %v3854_v8  ;;  %v3871_v19 = vld [vmem:[%s5974_s1 + $0x130] ss:$8 sps:$4 sm:$0xff]   ;;  %v3874_v21 = vld [vmem:[%s5974_s1 + $0x124] ss:$8 sps:$4 sm:$0xff]   ;;  %v3877_v23 = vld [vmem:[%s5974_s1 + $0x120] ss:$8 sps:$4 sm:$0xff]  }
   0x9   :  { %2443 = vmatprep.subr.bf16.mxu1 %v3856_v9  ;;  %v3878_v24 = vld [vmem:[%s5974_s1 + $0x14] ss:$8 sps:$4 sm:$0xff]   ;;  %v3882_v26 = vld [vmem:[%s5974_s1 + $0x10] ss:$8 sps:$4 sm:$0xff]   ;;  %v3884_v28 = vld [vmem:[%s5974_s1 + $0x4] ss:$8 sps:$4 sm:$0xff]  }
   0xa   :  { %v3880_v25 = vld [vmem:[%s5974_s1 + $0x114] ss:$8 sps:$4 sm:$0xff]   ;;  %v3883_v27 = vld [vmem:[%s5974_s1 + $0x110] ss:$8 sps:$4 sm:$0xff]   ;;  %v3886_v29 = vld [vmem:[%s5974_s1 + $0x104] ss:$8 sps:$4 sm:$0xff]  }
   0xb   :  { %2403 = vmatpush1.bf16.msra.mxu0 %v3858_v10  ;;  %v3888_v30 = vld [vmem:[%s5974_s1] ss:$8 sps:$4 sm:$0xff]   ;;  %v3890_v32 = vld [vmem:[%s5974_s1 + $0xf4] ss:$8 sps:$4 sm:$0xff]   ;;  %v3894_v34 = vld [vmem:[%s5974_s1 + $0xf0] ss:$8 sps:$4 sm:$0xff]  }
   0xc   :  { %2444 = vmatpush1.bf16.msra.mxu1 %v3859_v11  ;;  %2404 = vmatprep.subr.bf16.mxu0 %v3860_v12  ;;  %v3889_v31 = vld [vmem:[%s5974_s1 + $0x100] ss:$8 sps:$4 sm:$0xff]   ;;  %v3892_v33 = vld [vmem:[%s5974_s1 + $0x1f4] ss:$8 sps:$4 sm:$0xff]   ;;  %v3895_v35 = vld [vmem:[%s5974_s1 + $0x1f0] ss:$8 sps:$4 sm:$0xff]  }
   0xd   :  { %2445 = vmatprep.subr.bf16.mxu1 %v3862_v13  ;;  %v3896_v36 = vld [vmem:[%s5974_s1 + $0xe4] ss:$8 sps:$4 sm:$0xff]   ;;  %v3900_v38 = vld [vmem:[%s5974_s1 + $0xe0] ss:$8 sps:$4 sm:$0xff]   ;;  %v3902_v40 = vld [vmem:[%s5974_s1 + $0xd4] ss:$8 sps:$4 sm:$0xff]  }
   0xe   :  { %v3898_v37 = vld [vmem:[%s5974_s1 + $0x1e4] ss:$8 sps:$4 sm:$0xff]   ;;  %v3901_v39 = vld [vmem:[%s5974_s1 + $0x1e0] ss:$8 sps:$4 sm:$0xff]   ;;  %v3904_v41 = vld [vmem:[%s5974_s1 + $0x1d4] ss:$8 sps:$4 sm:$0xff]  }
   0xf   :  { %2405 = vmatpush1.bf16.msra.mxu0 %v3864_v14  ;;  %v3906_v42 = vld [vmem:[%s5974_s1 + $0xd0] ss:$8 sps:$4 sm:$0xff]   ;;  %v3908_v44 = vld [vmem:[%s5974_s1 + $0xc4] ss:$8 sps:$4 sm:$0xff]   ;;  %v3912_v47 = vld [vmem:[%s5974_s1 + $0xc0] ss:$8 sps:$4 sm:$0xff]  }
  0x10   :  { %2446 = vmatpush1.bf16.msra.mxu1 %v3865_v15  ;;  %2406 = vmatprep.subr.bf16.mxu0 %v3866_v16  ;;  %v3907_v43 = vld [vmem:[%s5974_s1 + $0x1d0] ss:$8 sps:$4 sm:$0xff]   ;;  %v3910_v45 = vld [vmem:[%s5974_s1 + $0x1c4] ss:$8 sps:$4 sm:$0xff]   ;;  %v3913_v48 = vld [vmem:[%s5974_s1 + $0x1c0] ss:$8 sps:$4 sm:$0xff]  }
  0x11   :  { %2447 = vmatprep.subr.bf16.mxu1 %v3868_v17  ;;  %v35_v46 = vld [vmem:[%s5973_s0 + $0x8] sm:$0xff]  ;;  %v37_v50 = vld [vmem:[%s5973_s0 + $0x18] sm:$0xff]  ;;  %v34_v4 = vld [vmem:[%s5973_s0] sm:$0xff] }
  0x12   :  { %v59_v49 = vpack.c.bf16 %v35_v46, %v35_v46  ;;  %v3914_v51 = vld [vmem:[%s5974_s1 + $0xb4] ss:$8 sps:$4 sm:$0xff]   ;;  %v61_v52 = vpack.c.bf16 %v37_v50, %v37_v50  ;;  %v3918_v54 = vld [vmem:[%s5974_s1 + $0xb0] ss:$8 sps:$4 sm:$0xff]   ;;  %v3920_v56 = vld [vmem:[%s5974_s1 + $0xa4] ss:$8 sps:$4 sm:$0xff]   ;;  %v58_v8 = vpack.c.bf16 %v34_v4, %v34_v4 }
  0x13   :  { %2407 = vmatpush1.bf16.msra.mxu0 %v3870_v18  ;;  %v3916_v53 = vld [vmem:[%s5974_s1 + $0x1b4] ss:$8 sps:$4 sm:$0xff]   ;;  %v3919_v55 = vld [vmem:[%s5974_s1 + $0x1b0] ss:$8 sps:$4 sm:$0xff]   ;;  %v3922_v57 = vld [vmem:[%s5974_s1 + $0x1a4] ss:$8 sps:$4 sm:$0xff]  }
  0x14   :  { %2448 = vmatpush1.bf16.msra.mxu1 %v3871_v19  ;;  %2408 = vmatprep.subr.bf16.mxu0 %v3872_v20  ;;  %v3924_v58 = vld [vmem:[%s5974_s1 + $0xa0] ss:$8 sps:$4 sm:$0xff]   ;;  %v3926_v60 = vld [vmem:[%s5974_s1 + $0x94] ss:$8 sps:$4 sm:$0xff]   ;;  %v3930_v62 = vld [vmem:[%s5974_s1 + $0x90] ss:$8 sps:$4 sm:$0xff]  }
  0x15   :  { %2449 = vmatprep.subr.bf16.mxu1 %v3874_v21  ;;  %2430 = vmatprep.mubr.bf16.mxu0 %v59_v49  ;;  %v3925_v59 = vld [vmem:[%s5974_s1 + $0x1a0] ss:$8 sps:$4 sm:$0xff]   ;;  %v3928_v61 = vld [vmem:[%s5974_s1 + $0x194] ss:$8 sps:$4 sm:$0xff]   ;;  %v3931_v63 = vld [vmem:[%s5974_s1 + $0x190] ss:$8 sps:$4 sm:$0xff]  }
  0x16   :  { %2471 = vmatprep.mubr.bf16.mxu1 %v61_v52  ;;  %v3932_v0 = vld [vmem:[%s5974_s1 + $0x84] ss:$8 sps:$4 sm:$0xff]   ;;  %v3936_v2 = vld [vmem:[%s5974_s1 + $0x80] ss:$8 sps:$4 sm:$0xff]   ;;  %v36_v5 = vld [vmem:[%s5973_s0 + $0x10] sm:$0xff] }
  0x17   :  { %2409 = vmatpush1.bf16.msra.mxu0 %v3876_v22  ;;  %v3934_v1 = vld [vmem:[%s5974_s1 + $0x184] ss:$8 sps:$4 sm:$0xff]   ;;  %v3937_v3 = vld [vmem:[%s5974_s1 + $0x180] ss:$8 sps:$4 sm:$0xff]   ;;  %v3940_v6 = vld [vmem:[%s5974_s1 + $0x274] ss:$8 sps:$4 sm:$0xff]   ;;  %v60_v9 = vpack.c.bf16 %v36_v5, %v36_v5 }
  0x18   :  { %2450 = vmatpush1.bf16.msra.mxu1 %v3877_v23  ;;  %2410 = vmatprep.subr.bf16.mxu0 %v3878_v24  ;;  %v3943_v7 = vld [vmem:[%s5974_s1 + $0x374] ss:$8 sps:$4 sm:$0xff]   ;;  %v3938_v10 = vld [vmem:[%s5974_s1 + $0x270] ss:$8 sps:$4 sm:$0xff]   ;;  %v3946_v12 = vld [vmem:[%s5974_s1 + $0x264] ss:$8 sps:$4 sm:$0xff]  }
  0x19   :  { %2451 = vmatprep.subr.bf16.mxu1 %v3880_v25  ;;  %v3941_v11 = vld [vmem:[%s5974_s1 + $0x370] ss:$8 sps:$4 sm:$0xff]   ;;  %v3949_v13 = vld [vmem:[%s5974_s1 + $0x364] ss:$8 sps:$4 sm:$0xff]   ;;  %v3944_v14 = vld [vmem:[%s5974_s1 + $0x260] ss:$8 sps:$4 sm:$0xff]  }
  0x1a   :  { %v3947_v15 = vld [vmem:[%s5974_s1 + $0x360] ss:$8 sps:$4 sm:$0xff]   ;;  %v3952_v16 = vld [vmem:[%s5974_s1 + $0x254] ss:$8 sps:$4 sm:$0xff]   ;;  %v3950_v18 = vld [vmem:[%s5974_s1 + $0x250] ss:$8 sps:$4 sm:$0xff]  }
  0x1b   :  { %2411 = vmatpush1.bf16.msra.mxu0 %v3882_v26  ;;  %v3955_v17 = vld [vmem:[%s5974_s1 + $0x354] ss:$8 sps:$4 sm:$0xff]   ;;  %v3953_v19 = vld [vmem:[%s5974_s1 + $0x350] ss:$8 sps:$4 sm:$0xff]   ;;  %v3958_v20 = vld [vmem:[%s5974_s1 + $0x244] ss:$8 sps:$4 sm:$0xff]  }
  0x1c   :  { %2452 = vmatpush1.bf16.msra.mxu1 %v3883_v27  ;;  %2412 = vmatprep.subr.bf16.mxu0 %v3884_v28  ;;  %v3961_v21 = vld [vmem:[%s5974_s1 + $0x344] ss:$8 sps:$4 sm:$0xff]   ;;  %v3956_v22 = vld [vmem:[%s5974_s1 + $0x240] ss:$8 sps:$4 sm:$0xff]   ;;  %v3964_v24 = vld [vmem:[%s5974_s1 + $0x234] ss:$8 sps:$4 sm:$0xff]  }
  0x1d   :  { %2453 = vmatprep.subr.bf16.mxu1 %v3886_v29  ;;  %v3959_v23 = vld [vmem:[%s5974_s1 + $0x340] ss:$8 sps:$4 sm:$0xff]   ;;  %v3967_v25 = vld [vmem:[%s5974_s1 + $0x334] ss:$8 sps:$4 sm:$0xff]   ;;  %v3962_v26 = vld [vmem:[%s5974_s1 + $0x230] ss:$8 sps:$4 sm:$0xff]  }
  0x1e   :  { %v3965_v27 = vld [vmem:[%s5974_s1 + $0x330] ss:$8 sps:$4 sm:$0xff]   ;;  %v3970_v28 = vld [vmem:[%s5974_s1 + $0x224] ss:$8 sps:$4 sm:$0xff]   ;;  %v3992_v50 = vld [vmem:[%s5974_s1 + $0x2e0] ss:$8 sps:$4 sm:$0xff]  }
  0x1f   :  { %2413 = vmatpush1.bf16.msra.mxu0 %v3888_v30  ;;  %v3973_v29 = vld [vmem:[%s5974_s1 + $0x324] ss:$8 sps:$4 sm:$0xff]   ;;  %v3968_v30 = vld [vmem:[%s5974_s1 + $0x220] ss:$8 sps:$4 sm:$0xff]   ;;  %v3986_v46 = vld [vmem:[%s5974_s1 + $0x2f0] ss:$8 sps:$4 sm:$0xff]  }
  0x20   :  { %2454 = vmatpush1.bf16.msra.mxu1 %v3889_v31  ;;  %2414 = vmatprep.subr.bf16.mxu0 %v3890_v32  ;;  %v3971_v31 = vld [vmem:[%s5974_s1 + $0x320] ss:$8 sps:$4 sm:$0xff]   ;;  %v3976_v32 = vld [vmem:[%s5974_s1 + $0x214] ss:$8 sps:$4 sm:$0xff]   ;;  %v3997_v49 = vld [vmem:[%s5974_s1 + $0x3e4] ss:$8 sps:$4 sm:$0xff]  }
  0x21   :  { %2455 = vmatprep.subr.bf16.mxu1 %v3892_v33  ;;  %v3979_v33 = vld [vmem:[%s5974_s1 + $0x314] ss:$8 sps:$4 sm:$0xff]  }
  0x22   :  { %v4000_v52 = vld [vmem:[%s5974_s1 + $0x2d4] ss:$8 sps:$4 sm:$0xff]  }
  0x23   :  { %2415 = vmatpush2.bf16.msra.mxu0 %v3894_v34  ;;  %v39_v34 = vld [vmem:[%s5973_s0 + $0x28] sm:$0xff]  ;;  %v4024_v4 = vld [vmem:[%s5974_s1 + $0x294] ss:$8 sps:$4 sm:$0xff]  }
  0x24   :  { %2456 = vmatpush2.bf16.msra.mxu1 %v3895_v35  ;;  %2416 = vmatprep.subr.bf16.mxu0 %v3896_v36  ;;  %v3974_v35 = vld [vmem:[%s5974_s1 + $0x210] ss:$8 sps:$4 sm:$0xff]   ;;  %v4027_v5 = vld [vmem:[%s5974_s1 + $0x394] ss:$8 sps:$4 sm:$0xff]  }
  0x25   :  { %2457 = vmatprep.subr.bf16.mxu1 %v3898_v37  ;;  %v3977_v36 = vld [vmem:[%s5974_s1 + $0x310] ss:$8 sps:$4 sm:$0xff]   ;;  %v63_v37 = vpack.c.bf16 %v39_v34, %v39_v34  ;;  %v4052_v34 = vld [vmem:[%s5974_s1 + $0x440] ss:$8 sps:$4 sm:$0xff]  }
  0x27   :  { %2417 = vmatpush2.bf16.msra.mxu0 %v3900_v38  ;;  %v41_v38 = vld [vmem:[%s5973_s0 + $0x38] sm:$0xff] }
  0x28   :  { %2458 = vmatpush2.bf16.msra.mxu1 %v3901_v39  ;;  %2418 = vmatprep.subr.bf16.mxu0 %v3902_v40  ;;  %v3982_v39 = vld [vmem:[%s5974_s1 + $0x204] ss:$8 sps:$4 sm:$0xff]   ;;  %v65_v40 = vpack.c.bf16 %v41_v38, %v41_v38  ;;  %v4058_v38 = vld [vmem:[%s5974_s1 + $0x430] ss:$8 sps:$4 sm:$0xff]  }
  0x29   :  { %2459 = vmatprep.subr.bf16.mxu1 %v3904_v41  ;;  %v3985_v41 = vld [vmem:[%s5974_s1 + $0x304] ss:$8 sps:$4 sm:$0xff]  }
  0x2b   :  { %2419 = vmatpush2.bf16.msra.mxu0 %v3906_v42  ;;  %v3980_v42 = vld [vmem:[%s5974_s1 + $0x200] ss:$8 sps:$4 sm:$0xff]  }
  0x2c   :  { %2460 = vmatpush2.bf16.msra.mxu1 %v3907_v43  ;;  %2420 = vmatprep.subr.bf16.mxu0 %v3908_v44  ;;  %v3983_v43 = vld [vmem:[%s5974_s1 + $0x300] ss:$8 sps:$4 sm:$0xff]   ;;  %v3988_v44 = vld [vmem:[%s5974_s1 + $0x2f4] ss:$8 sps:$4 sm:$0xff]  }
  0x2d   :  { %2461 = vmatprep.subr.bf16.mxu1 %v3910_v45  ;;  %v3991_v45 = vld [vmem:[%s5974_s1 + $0x3f4] ss:$8 sps:$4 sm:$0xff]  }
  0x2f   :  { %2421 = vmatpush2.bf16.msra.mxu0 %v3912_v47  ;;  %v3989_v47 = vld [vmem:[%s5974_s1 + $0x3f0] ss:$8 sps:$4 sm:$0xff]  }
  0x30   :  { %2462 = vmatpush2.bf16.msra.mxu1 %v3913_v48  ;;  %2422 = vmatprep.subr.bf16.mxu0 %v3914_v51  ;;  %v3994_v48 = vld [vmem:[%s5974_s1 + $0x2e4] ss:$8 sps:$4 sm:$0xff]   ;;  %v3995_v51 = vld [vmem:[%s5974_s1 + $0x3e0] ss:$8 sps:$4 sm:$0xff]  }
  0x31   :  { %2463 = vmatprep.subr.bf16.mxu1 %v3916_v53  ;;  %v4003_v53 = vld [vmem:[%s5974_s1 + $0x3d4] ss:$8 sps:$4 sm:$0xff]  }
  0x33   :  { %2423 = vmatpush2.bf16.msra.mxu0 %v3918_v54  ;;  %v3998_v54 = vld [vmem:[%s5974_s1 + $0x2d0] ss:$8 sps:$4 sm:$0xff]  }
  0x34   :  { %2464 = vmatpush2.bf16.msra.mxu1 %v3919_v55  ;;  %2424 = vmatprep.subr.bf16.mxu0 %v3920_v56  ;;  %v4001_v55 = vld [vmem:[%s5974_s1 + $0x3d0] ss:$8 sps:$4 sm:$0xff]   ;;  %v4006_v56 = vld [vmem:[%s5974_s1 + $0x2c4] ss:$8 sps:$4 sm:$0xff]  }
  0x35   :  { %2465 = vmatprep.subr.bf16.mxu1 %v3922_v57  ;;  %v4009_v57 = vld [vmem:[%s5974_s1 + $0x3c4] ss:$8 sps:$4 sm:$0xff]  }
  0x37   :  { %2425 = vmatpush2.bf16.msra.mxu0 %v3924_v58  ;;  %v4004_v58 = vld [vmem:[%s5974_s1 + $0x2c0] ss:$8 sps:$4 sm:$0xff]  }
  0x38   :  { %2466 = vmatpush2.bf16.msra.mxu1 %v3925_v59  ;;  %2426 = vmatprep.subr.bf16.mxu0 %v3926_v60  ;;  %v4007_v59 = vld [vmem:[%s5974_s1 + $0x3c0] ss:$8 sps:$4 sm:$0xff]   ;;  %v4012_v60 = vld [vmem:[%s5974_s1 + $0x2b4] ss:$8 sps:$4 sm:$0xff]  }
  0x39   :  { %2467 = vmatprep.subr.bf16.mxu1 %v3928_v61  ;;  %v4015_v61 = vld [vmem:[%s5974_s1 + $0x3b4] ss:$8 sps:$4 sm:$0xff]  }
  0x3b   :  { %2427 = vmatpush2.bf16.msra.mxu0 %v3930_v62  ;;  %v4010_v62 = vld [vmem:[%s5974_s1 + $0x2b0] ss:$8 sps:$4 sm:$0xff]  }
  0x3c   :  { %2468 = vmatpush2.bf16.msra.mxu1 %v3931_v63  ;;  %2428 = vmatprep.subr.bf16.mxu0 %v3932_v0  ;;  %v4013_v63 = vld [vmem:[%s5974_s1 + $0x3b0] ss:$8 sps:$4 sm:$0xff]   ;;  %v4018_v0 = vld [vmem:[%s5974_s1 + $0x2a4] ss:$8 sps:$4 sm:$0xff]  }
  0x3d   :  { %2469 = vmatprep.subr.bf16.mxu1 %v3934_v1  ;;  %v4021_v1 = vld [vmem:[%s5974_s1 + $0x3a4] ss:$8 sps:$4 sm:$0xff]  }
  0x3f   :  { %2429 = vmatpush2.bf16.msra.mxu0 %v3936_v2  ;;  %v4016_v2 = vld [vmem:[%s5974_s1 + $0x2a0] ss:$8 sps:$4 sm:$0xff]  }
  0x40   :  { %2470 = vmatpush2.bf16.msra.mxu1 %v3937_v3  ;;  %2480 = vmatprep.subr.bf16.mxu0 %v3940_v6  ;;  %v4019_v3 = vld [vmem:[%s5974_s1 + $0x3a0] ss:$8 sps:$4 sm:$0xff]   ;;  %v4022_v6 = vld [vmem:[%s5974_s1 + $0x290] ss:$8 sps:$4 sm:$0xff]  }
  0x41   :  { %2521 = vmatprep.subr.bf16.mxu1 %v3943_v7  ;;  %v4025_v7 = vld [vmem:[%s5974_s1 + $0x390] ss:$8 sps:$4 sm:$0xff]  }
  0x42   :  { %2431 = vmatmul.mubr.bf16.vlgmr.msra.gmra.mxu0 %v58_v8  ;;  %v4030_v8 = vld [vmem:[%s5974_s1 + $0x284] ss:$8 sps:$4 sm:$0xff]  }
  0x43   :  { %2472 = vmatmul.mubr.bf16.vlgmr.msra.gmra.mxu1 %v60_v9  ;;  %2481 = vmatpush1.bf16.msra.mxu0 %v3938_v10  ;;  %v4033_v9 = vld [vmem:[%s5974_s1 + $0x384] ss:$8 sps:$4 sm:$0xff]   ;;  %v4028_v10 = vld [vmem:[%s5974_s1 + $0x280] ss:$8 sps:$4 sm:$0xff]  }
  0x44   :  { %2522 = vmatpush1.bf16.msra.mxu1 %v3941_v11  ;;  %2482 = vmatprep.subr.bf16.mxu0 %v3946_v12  ;;  %v4031_v11 = vld [vmem:[%s5974_s1 + $0x380] ss:$8 sps:$4 sm:$0xff]  }
  0x45   :  { %2523 = vmatprep.subr.bf16.mxu1 %v3949_v13  ;;  %2512 = vmatprep.mubr.bf16.mxu0 %v63_v37  ;;  %v38_v12 = vld [vmem:[%s5973_s0 + $0x20] sm:$0xff]  ;;  %v40_v13 = vld [vmem:[%s5973_s0 + $0x30] sm:$0xff] }
  0x46   :  { %2553 = vmatprep.mubr.bf16.mxu1 %v65_v40  ;;  %v4063_v37 = vld [vmem:[%s5974_s1 + $0x534] ss:$8 sps:$4 sm:$0xff]   ;;  %v4066_v40 = vld [vmem:[%s5974_s1 + $0x424] ss:$8 sps:$4 sm:$0xff]  }
  0x47   :  { %2483 = vmatpush1.bf16.msra.mxu0 %v3944_v14  ;;  %v4036_v14 = vld [vmem:[%s5974_s1 + $0x474] ss:$8 sps:$4 sm:$0xff]  }
  0x48   :  { %2524 = vmatpush1.bf16.msra.mxu1 %v3947_v15  ;;  %2484 = vmatprep.subr.bf16.mxu0 %v3952_v16  ;;  %v4039_v15 = vld [vmem:[%s5974_s1 + $0x574] ss:$8 sps:$4 sm:$0xff]   ;;  %v62_v16 = vpack.c.bf16 %v38_v12, %v38_v12 }
  0x49   :  { %2525 = vmatprep.subr.bf16.mxu1 %v3955_v17  ;;  %v64_v17 = vpack.c.bf16 %v40_v13, %v40_v13  ;;  %v4120_v12 = vld [vmem:[%s5974_s1 + $0x494] ss:$8 sps:$4 sm:$0xff]  }
  0x4a   :  { %v4123_v13 = vld [vmem:[%s5974_s1 + $0x594] ss:$8 sps:$4 sm:$0xff]  }
  0x4b   :  { %2485 = vmatpush1.bf16.msra.mxu0 %v3950_v18  ;;  %v4034_v18 = vld [vmem:[%s5974_s1 + $0x470] ss:$8 sps:$4 sm:$0xff]  }
  0x4c   :  { %2526 = vmatpush1.bf16.msra.mxu1 %v3953_v19  ;;  %2486 = vmatprep.subr.bf16.mxu0 %v3958_v20  ;;  %v4037_v19 = vld [vmem:[%s5974_s1 + $0x570] ss:$8 sps:$4 sm:$0xff]   ;;  %v4042_v20 = vld [vmem:[%s5974_s1 + $0x464] ss:$8 sps:$4 sm:$0xff]  }
  0x4d   :  { %2527 = vmatprep.subr.bf16.mxu1 %v3961_v21  ;;  %v4045_v21 = vld [vmem:[%s5974_s1 + $0x564] ss:$8 sps:$4 sm:$0xff]  }
  0x4f   :  { %2487 = vmatpush1.bf16.msra.mxu0 %v3956_v22  ;;  %v43_v22 = vld [vmem:[%s5973_s0 + $0x48] sm:$0xff] }
  0x50   :  { %2528 = vmatpush1.bf16.msra.mxu1 %v3959_v23  ;;  %2488 = vmatprep.subr.bf16.mxu0 %v3964_v24  ;;  %v4040_v23 = vld [vmem:[%s5974_s1 + $0x460] ss:$8 sps:$4 sm:$0xff]  }
  0x51   :  { %2529 = vmatprep.subr.bf16.mxu1 %v3967_v25  ;;  %v4043_v24 = vld [vmem:[%s5974_s1 + $0x560] ss:$8 sps:$4 sm:$0xff]   ;;  %v67_v25 = vpack.c.bf16 %v43_v22, %v43_v22  ;;  %v4132_v22 = vld [vmem:[%s5974_s1 + $0x674] ss:$8 sps:$4 sm:$0xff]  }
  0x53   :  { %2489 = vmatpush1.bf16.msra.mxu0 %v3962_v26  ;;  %v45_v26 = vld [vmem:[%s5973_s0 + $0x58] sm:$0xff] }
  0x54   :  { %2530 = vmatpush1.bf16.msra.mxu1 %v3965_v27  ;;  %2490 = vmatprep.subr.bf16.mxu0 %v3970_v28  ;;  %v4048_v27 = vld [vmem:[%s5974_s1 + $0x454] ss:$8 sps:$4 sm:$0xff]   ;;  %v69_v28 = vpack.c.bf16 %v45_v26, %v45_v26 }
  0x55   :  { %2531 = vmatprep.subr.bf16.mxu1 %v3973_v29  ;;  %v4051_v29 = vld [vmem:[%s5974_s1 + $0x554] ss:$8 sps:$4 sm:$0xff]  }
  0x57   :  { %2491 = vmatpush1.bf16.msra.mxu0 %v3968_v30  ;;  %v4046_v30 = vld [vmem:[%s5974_s1 + $0x450] ss:$8 sps:$4 sm:$0xff]  }
  0x58   :  { %2532 = vmatpush1.bf16.msra.mxu1 %v3971_v31  ;;  %2492 = vmatprep.subr.bf16.mxu0 %v3976_v32  ;;  %v4049_v31 = vld [vmem:[%s5974_s1 + $0x550] ss:$8 sps:$4 sm:$0xff]   ;;  %v4054_v32 = vld [vmem:[%s5974_s1 + $0x444] ss:$8 sps:$4 sm:$0xff]  }
  0x59   :  { %2533 = vmatprep.subr.bf16.mxu1 %v3979_v33  ;;  %v4057_v33 = vld [vmem:[%s5974_s1 + $0x544] ss:$8 sps:$4 sm:$0xff]  }
  0x5b   :  { %2493 = vmatpush1.bf16.msra.mxu0 %v3974_v35  ;;  %v4055_v35 = vld [vmem:[%s5974_s1 + $0x540] ss:$8 sps:$4 sm:$0xff]  }
  0x5c   :  { %2534 = vmatpush1.bf16.msra.mxu1 %v3977_v36  ;;  %2494 = vmatprep.subr.bf16.mxu0 %v3982_v39  ;;  %v4060_v36 = vld [vmem:[%s5974_s1 + $0x434] ss:$8 sps:$4 sm:$0xff]   ;;  %v4061_v39 = vld [vmem:[%s5974_s1 + $0x530] ss:$8 sps:$4 sm:$0xff]  }
  0x5d   :  { %2535 = vmatprep.subr.bf16.mxu1 %v3985_v41  ;;  %v4069_v41 = vld [vmem:[%s5974_s1 + $0x524] ss:$8 sps:$4 sm:$0xff]  }
  0x5f   :  { %2495 = vmatpush1.bf16.msra.mxu0 %v3980_v42  ;;  %v4064_v42 = vld [vmem:[%s5974_s1 + $0x420] ss:$8 sps:$4 sm:$0xff]  }
  0x60   :  { %2536 = vmatpush1.bf16.msra.mxu1 %v3983_v43  ;;  %2496 = vmatprep.subr.bf16.mxu0 %v3988_v44  ;;  %v4067_v43 = vld [vmem:[%s5974_s1 + $0x520] ss:$8 sps:$4 sm:$0xff]   ;;  %v4072_v44 = vld [vmem:[%s5974_s1 + $0x414] ss:$8 sps:$4 sm:$0xff]  }
  0x61   :  { %2537 = vmatprep.subr.bf16.mxu1 %v3991_v45  ;;  %v4075_v45 = vld [vmem:[%s5974_s1 + $0x514] ss:$8 sps:$4 sm:$0xff]  }
  0x63   :  { %2497 = vmatpush2.bf16.msra.mxu0 %v3986_v46  ;;  %v4070_v46 = vld [vmem:[%s5974_s1 + $0x410] ss:$8 sps:$4 sm:$0xff]  }
  0x64   :  { %2538 = vmatpush2.bf16.msra.mxu1 %v3989_v47  ;;  %2498 = vmatprep.subr.bf16.mxu0 %v3994_v48  ;;  %v4073_v47 = vld [vmem:[%s5974_s1 + $0x510] ss:$8 sps:$4 sm:$0xff]   ;;  %v4078_v48 = vld [vmem:[%s5974_s1 + $0x404] ss:$8 sps:$4 sm:$0xff]  }
  0x65   :  { %2539 = vmatprep.subr.bf16.mxu1 %v3997_v49  ;;  %v4081_v49 = vld [vmem:[%s5974_s1 + $0x504] ss:$8 sps:$4 sm:$0xff]  }
  0x67   :  { %2499 = vmatpush2.bf16.msra.mxu0 %v3992_v50  ;;  %v4076_v50 = vld [vmem:[%s5974_s1 + $0x400] ss:$8 sps:$4 sm:$0xff]  }
  0x68   :  { %2540 = vmatpush2.bf16.msra.mxu1 %v3995_v51  ;;  %2500 = vmatprep.subr.bf16.mxu0 %v4000_v52  ;;  %v4079_v51 = vld [vmem:[%s5974_s1 + $0x500] ss:$8 sps:$4 sm:$0xff]   ;;  %v4084_v52 = vld [vmem:[%s5974_s1 + $0x4f4] ss:$8 sps:$4 sm:$0xff]  }
  0x69   :  { %2541 = vmatprep.subr.bf16.mxu1 %v4003_v53  ;;  %v4087_v53 = vld [vmem:[%s5974_s1 + $0x5f4] ss:$8 sps:$4 sm:$0xff]  }
  0x6b   :  { %2501 = vmatpush2.bf16.msra.mxu0 %v3998_v54  ;;  %v4082_v54 = vld [vmem:[%s5974_s1 + $0x4f0] ss:$8 sps:$4 sm:$0xff]  }
  0x6c   :  { %2542 = vmatpush2.bf16.msra.mxu1 %v4001_v55  ;;  %2502 = vmatprep.subr.bf16.mxu0 %v4006_v56  ;;  %v4085_v55 = vld [vmem:[%s5974_s1 + $0x5f0] ss:$8 sps:$4 sm:$0xff]   ;;  %v4090_v56 = vld [vmem:[%s5974_s1 + $0x4e4] ss:$8 sps:$4 sm:$0xff]  }
  0x6d   :  { %2543 = vmatprep.subr.bf16.mxu1 %v4009_v57  ;;  %v4093_v57 = vld [vmem:[%s5974_s1 + $0x5e4] ss:$8 sps:$4 sm:$0xff]  }
  0x6f   :  { %2503 = vmatpush2.bf16.msra.mxu0 %v4004_v58  ;;  %v4088_v58 = vld [vmem:[%s5974_s1 + $0x4e0] ss:$8 sps:$4 sm:$0xff]  }
  0x70   :  { %2544 = vmatpush2.bf16.msra.mxu1 %v4007_v59  ;;  %2504 = vmatprep.subr.bf16.mxu0 %v4012_v60  ;;  %v4091_v59 = vld [vmem:[%s5974_s1 + $0x5e0] ss:$8 sps:$4 sm:$0xff]   ;;  %v4096_v60 = vld [vmem:[%s5974_s1 + $0x4d4] ss:$8 sps:$4 sm:$0xff]  }
  0x71   :  { %2545 = vmatprep.subr.bf16.mxu1 %v4015_v61  ;;  %v4099_v61 = vld [vmem:[%s5974_s1 + $0x5d4] ss:$8 sps:$4 sm:$0xff]  }
  0x73   :  { %2505 = vmatpush2.bf16.msra.mxu0 %v4010_v62  ;;  %v4094_v62 = vld [vmem:[%s5974_s1 + $0x4d0] ss:$8 sps:$4 sm:$0xff]  }
  0x74   :  { %2546 = vmatpush2.bf16.msra.mxu1 %v4013_v63  ;;  %2506 = vmatprep.subr.bf16.mxu0 %v4018_v0  ;;  %v4097_v63 = vld [vmem:[%s5974_s1 + $0x5d0] ss:$8 sps:$4 sm:$0xff]   ;;  %v4102_v0 = vld [vmem:[%s5974_s1 + $0x4c4] ss:$8 sps:$4 sm:$0xff]  }
  0x75   :  { %2547 = vmatprep.subr.bf16.mxu1 %v4021_v1  ;;  %v4105_v1 = vld [vmem:[%s5974_s1 + $0x5c4] ss:$8 sps:$4 sm:$0xff]  }
  0x77   :  { %2507 = vmatpush2.bf16.msra.mxu0 %v4016_v2  ;;  %v4100_v2 = vld [vmem:[%s5974_s1 + $0x4c0] ss:$8 sps:$4 sm:$0xff]  }
  0x78   :  { %2548 = vmatpush2.bf16.msra.mxu1 %v4019_v3  ;;  %2508 = vmatprep.subr.bf16.mxu0 %v4024_v4  ;;  %v4103_v3 = vld [vmem:[%s5974_s1 + $0x5c0] ss:$8 sps:$4 sm:$0xff]   ;;  %v4108_v4 = vld [vmem:[%s5974_s1 + $0x4b4] ss:$8 sps:$4 sm:$0xff]  }
  0x79   :  { %2549 = vmatprep.subr.bf16.mxu1 %v4027_v5  ;;  %v4111_v5 = vld [vmem:[%s5974_s1 + $0x5b4] ss:$8 sps:$4 sm:$0xff]  }
  0x7b   :  { %2509 = vmatpush2.bf16.msra.mxu0 %v4022_v6  ;;  %v4106_v6 = vld [vmem:[%s5974_s1 + $0x4b0] ss:$8 sps:$4 sm:$0xff]  }
  0x7c   :  { %2550 = vmatpush2.bf16.msra.mxu1 %v4025_v7  ;;  %2510 = vmatprep.subr.bf16.mxu0 %v4030_v8  ;;  %v4109_v7 = vld [vmem:[%s5974_s1 + $0x5b0] ss:$8 sps:$4 sm:$0xff]   ;;  %v4114_v8 = vld [vmem:[%s5974_s1 + $0x4a4] ss:$8 sps:$4 sm:$0xff]  }
  0x7d   :  { %2551 = vmatprep.subr.bf16.mxu1 %v4033_v9  ;;  %v4117_v9 = vld [vmem:[%s5974_s1 + $0x5a4] ss:$8 sps:$4 sm:$0xff]  }
  0x7f   :  { %2511 = vmatpush2.bf16.msra.mxu0 %v4028_v10  ;;  %v4112_v10 = vld [vmem:[%s5974_s1 + $0x4a0] ss:$8 sps:$4 sm:$0xff]  }
  0x80   :  { %2552 = vmatpush2.bf16.msra.mxu1 %v4031_v11  ;;  %2562 = vmatprep.subr.bf16.mxu0 %v4036_v14  ;;  %v4115_v11 = vld [vmem:[%s5974_s1 + $0x5a0] ss:$8 sps:$4 sm:$0xff]   ;;  %v4118_v14 = vld [vmem:[%s5974_s1 + $0x490] ss:$8 sps:$4 sm:$0xff]  }
  0x81   :  { %2603 = vmatprep.subr.bf16.mxu1 %v4039_v15  ;;  %v4121_v15 = vld [vmem:[%s5974_s1 + $0x590] ss:$8 sps:$4 sm:$0xff]  }
  0x82   :  { %2513 = vmatmul.mubr.bf16.vlgmr.msra.gmra.mxu0 %v62_v16  ;;  %v4126_v16 = vld [vmem:[%s5974_s1 + $0x484] ss:$8 sps:$4 sm:$0xff]  }
  0x83   :  { %2554 = vmatmul.mubr.bf16.vlgmr.msra.gmra.mxu1 %v64_v17  ;;  %2563 = vmatpush1.bf16.msra.mxu0 %v4034_v18  ;;  %v4129_v17 = vld [vmem:[%s5974_s1 + $0x584] ss:$8 sps:$4 sm:$0xff]   ;;  %v4124_v18 = vld [vmem:[%s5974_s1 + $0x480] ss:$8 sps:$4 sm:$0xff]  }
  0x84   :  { %2604 = vmatpush1.bf16.msra.mxu1 %v4037_v19  ;;  %2564 = vmatprep.subr.bf16.mxu0 %v4042_v20  ;;  %v4127_v19 = vld [vmem:[%s5974_s1 + $0x580] ss:$8 sps:$4 sm:$0xff]  }
  0x85   :  { %2605 = vmatprep.subr.bf16.mxu1 %v4045_v21  ;;  %2594 = vmatprep.mubr.bf16.mxu0 %v67_v25  ;;  %v42_v20 = vld [vmem:[%s5973_s0 + $0x40] sm:$0xff]  ;;  %v44_v21 = vld [vmem:[%s5973_s0 + $0x50] sm:$0xff]  ;;  %v47_v25 = vld [vmem:[%s5973_s0 + $0x68] sm:$0xff] }
  0x86   :  { %2635 = vmatprep.mubr.bf16.mxu1 %v69_v28  ;;  %v66_v26 = vpack.c.bf16 %v42_v20, %v42_v20  ;;  %v49_v28 = vld [vmem:[%s5973_s0 + $0x78] sm:$0xff]  ;;  %v468_v20 = vlaneseq }
  0x87   :  { %2565 = vmatpush1.bf16.msra.mxu0 %v4040_v23  ;;  %v4135_v23 = vld [vmem:[%s5974_s1 + $0x774] ss:$8 sps:$4 sm:$0xff]  }
  0x88   :  { %2606 = vmatpush1.bf16.msra.mxu1 %v4043_v24  ;;  %2566 = vmatprep.subr.bf16.mxu0 %v4048_v27  ;;  %v4130_v24 = vld [vmem:[%s5974_s1 + $0x670] ss:$8 sps:$4 sm:$0xff]   ;;  %v68_v27 = vpack.c.bf16 %v44_v21, %v44_v21  ;;  %v4216_v21 = vld [vmem:[%s5974_s1 + $0x694] ss:$8 sps:$4 sm:$0xff]  }
  0x89   :  { %2607 = vmatprep.subr.bf16.mxu1 %v4051_v29  ;;  %v4133_v29 = vld [vmem:[%s5974_s1 + $0x770] ss:$8 sps:$4 sm:$0xff]  }
  0x8b   :  { %2567 = vmatpush1.bf16.msra.mxu0 %v4046_v30  ;;  %v4138_v30 = vld [vmem:[%s5974_s1 + $0x664] ss:$8 sps:$4 sm:$0xff]  }
  0x8c   :  { %2608 = vmatpush1.bf16.msra.mxu1 %v4049_v31  ;;  %2568 = vmatprep.subr.bf16.mxu0 %v4054_v32  ;;  %v4141_v31 = vld [vmem:[%s5974_s1 + $0x764] ss:$8 sps:$4 sm:$0xff]   ;;  %v71_v32 = vpack.c.bf16 %v47_v25, %v47_v25  ;;  %v469_v25 = vshrl.u32 %v468_v20, 7 }
  0x8d   :  { %2609 = vmatprep.subr.bf16.mxu1 %v4057_v33  ;;  %v73_v33 = vpack.c.bf16 %v49_v28, %v49_v28  ;;  %v4220_v28 = vld [vmem:[%s5974_s1 + $0x680] ss:$8 sps:$4 sm:$0xff]   ;;  %v4273_v20 = vld [vmem:[%s5974_s1 + $0x904] ss:$8 sps:$4 sm:$0xff]  }
  0x8f   :  { %2569 = vmatpush1.bf16.msra.mxu0 %v4052_v34  ;;  %v4136_v34 = vld [vmem:[%s5974_s1 + $0x660] ss:$8 sps:$4 sm:$0xff]  }
  0x90   :  { %2610 = vmatpush1.bf16.msra.mxu1 %v4055_v35  ;;  %2570 = vmatprep.subr.bf16.mxu0 %v4060_v36  ;;  %v4139_v35 = vld [vmem:[%s5974_s1 + $0x760] ss:$8 sps:$4 sm:$0xff]   ;;  %v4144_v36 = vld [vmem:[%s5974_s1 + $0x654] ss:$8 sps:$4 sm:$0xff]  }
  0x91   :  { %2611 = vmatprep.subr.bf16.mxu1 %v4063_v37  ;;  %v4147_v37 = vld [vmem:[%s5974_s1 + $0x754] ss:$8 sps:$4 sm:$0xff]  }
  0x93   :  { %2571 = vmatpush1.bf16.msra.mxu0 %v4058_v38  ;;  %v4142_v38 = vld [vmem:[%s5974_s1 + $0x650] ss:$8 sps:$4 sm:$0xff]  }
  0x94   :  { %2612 = vmatpush1.bf16.msra.mxu1 %v4061_v39  ;;  %2572 = vmatprep.subr.bf16.mxu0 %v4066_v40  ;;  %v4145_v39 = vld [vmem:[%s5974_s1 + $0x750] ss:$8 sps:$4 sm:$0xff]   ;;  %v4150_v40 = vld [vmem:[%s5974_s1 + $0x644] ss:$8 sps:$4 sm:$0xff]  }
  0x95   :  { %2613 = vmatprep.subr.bf16.mxu1 %v4069_v41  ;;  %v4153_v41 = vld [vmem:[%s5974_s1 + $0x744] ss:$8 sps:$4 sm:$0xff]  }
  0x97   :  { %2573 = vmatpush1.bf16.msra.mxu0 %v4064_v42  ;;  %v4148_v42 = vld [vmem:[%s5974_s1 + $0x640] ss:$8 sps:$4 sm:$0xff]  }
  0x98   :  { %2614 = vmatpush1.bf16.msra.mxu1 %v4067_v43  ;;  %2574 = vmatprep.subr.bf16.mxu0 %v4072_v44  ;;  %v4151_v43 = vld [vmem:[%s5974_s1 + $0x740] ss:$8 sps:$4 sm:$0xff]   ;;  %v4156_v44 = vld [vmem:[%s5974_s1 + $0x634] ss:$8 sps:$4 sm:$0xff]  }
  0x99   :  { %2615 = vmatprep.subr.bf16.mxu1 %v4075_v45  ;;  %v4159_v45 = vld [vmem:[%s5974_s1 + $0x734] ss:$8 sps:$4 sm:$0xff]  }
  0x9b   :  { %2575 = vmatpush1.bf16.msra.mxu0 %v4070_v46  ;;  %v4154_v46 = vld [vmem:[%s5974_s1 + $0x630] ss:$8 sps:$4 sm:$0xff]  }
  0x9c   :  { %2616 = vmatpush1.bf16.msra.mxu1 %v4073_v47  ;;  %2576 = vmatprep.subr.bf16.mxu0 %v4078_v48  ;;  %v4157_v47 = vld [vmem:[%s5974_s1 + $0x730] ss:$8 sps:$4 sm:$0xff]   ;;  %v4162_v48 = vld [vmem:[%s5974_s1 + $0x624] ss:$8 sps:$4 sm:$0xff]  }
  0x9d   :  { %2617 = vmatprep.subr.bf16.mxu1 %v4081_v49  ;;  %v4165_v49 = vld [vmem:[%s5974_s1 + $0x724] ss:$8 sps:$4 sm:$0xff]  }
  0x9f   :  { %2577 = vmatpush1.bf16.msra.mxu0 %v4076_v50  ;;  %v4160_v50 = vld [vmem:[%s5974_s1 + $0x620] ss:$8 sps:$4 sm:$0xff]  }
  0xa0   :  { %2618 = vmatpush1.bf16.msra.mxu1 %v4079_v51  ;;  %2578 = vmatprep.subr.bf16.mxu0 %v4084_v52  ;;  %v4163_v51 = vld [vmem:[%s5974_s1 + $0x720] ss:$8 sps:$4 sm:$0xff]   ;;  %v4168_v52 = vld [vmem:[%s5974_s1 + $0x614] ss:$8 sps:$4 sm:$0xff]  }
  0xa1   :  { %2619 = vmatprep.subr.bf16.mxu1 %v4087_v53  ;;  %v4171_v53 = vld [vmem:[%s5974_s1 + $0x714] ss:$8 sps:$4 sm:$0xff]  }
  0xa3   :  { %2579 = vmatpush2.bf16.msra.mxu0 %v4082_v54  ;;  %v4166_v54 = vld [vmem:[%s5974_s1 + $0x610] ss:$8 sps:$4 sm:$0xff]  }
  0xa4   :  { %2620 = vmatpush2.bf16.msra.mxu1 %v4085_v55  ;;  %2580 = vmatprep.subr.bf16.mxu0 %v4090_v56  ;;  %v4169_v55 = vld [vmem:[%s5974_s1 + $0x710] ss:$8 sps:$4 sm:$0xff]   ;;  %v4174_v56 = vld [vmem:[%s5974_s1 + $0x604] ss:$8 sps:$4 sm:$0xff]  }
  0xa5   :  { %2621 = vmatprep.subr.bf16.mxu1 %v4093_v57  ;;  %v4177_v57 = vld [vmem:[%s5974_s1 + $0x704] ss:$8 sps:$4 sm:$0xff]  }
  0xa7   :  { %2581 = vmatpush2.bf16.msra.mxu0 %v4088_v58  ;;  %v4172_v58 = vld [vmem:[%s5974_s1 + $0x600] ss:$8 sps:$4 sm:$0xff]  }
  0xa8   :  { %2622 = vmatpush2.bf16.msra.mxu1 %v4091_v59  ;;  %2582 = vmatprep.subr.bf16.mxu0 %v4096_v60  ;;  %v4175_v59 = vld [vmem:[%s5974_s1 + $0x700] ss:$8 sps:$4 sm:$0xff]   ;;  %v4180_v60 = vld [vmem:[%s5974_s1 + $0x6f4] ss:$8 sps:$4 sm:$0xff]  }
  0xa9   :  { %2623 = vmatprep.subr.bf16.mxu1 %v4099_v61  ;;  %v4183_v61 = vld [vmem:[%s5974_s1 + $0x7f4] ss:$8 sps:$4 sm:$0xff]  }
  0xab   :  { %2583 = vmatpush2.bf16.msra.mxu0 %v4094_v62  ;;  %v4178_v62 = vld [vmem:[%s5974_s1 + $0x6f0] ss:$8 sps:$4 sm:$0xff]  }
  0xac   :  { %2624 = vmatpush2.bf16.msra.mxu1 %v4097_v63  ;;  %2584 = vmatprep.subr.bf16.mxu0 %v4102_v0  ;;  %v4181_v63 = vld [vmem:[%s5974_s1 + $0x7f0] ss:$8 sps:$4 sm:$0xff]   ;;  %v4186_v0 = vld [vmem:[%s5974_s1 + $0x6e4] ss:$8 sps:$4 sm:$0xff]  }
  0xad   :  { %2625 = vmatprep.subr.bf16.mxu1 %v4105_v1  ;;  %v4189_v1 = vld [vmem:[%s5974_s1 + $0x7e4] ss:$8 sps:$4 sm:$0xff]  }
  0xaf   :  { %2585 = vmatpush2.bf16.msra.mxu0 %v4100_v2  ;;  %v4184_v2 = vld [vmem:[%s5974_s1 + $0x6e0] ss:$8 sps:$4 sm:$0xff]  }
  0xb0   :  { %2626 = vmatpush2.bf16.msra.mxu1 %v4103_v3  ;;  %2586 = vmatprep.subr.bf16.mxu0 %v4108_v4  ;;  %v4187_v3 = vld [vmem:[%s5974_s1 + $0x7e0] ss:$8 sps:$4 sm:$0xff]   ;;  %v4192_v4 = vld [vmem:[%s5974_s1 + $0x6d4] ss:$8 sps:$4 sm:$0xff]  }
  0xb1   :  { %2627 = vmatprep.subr.bf16.mxu1 %v4111_v5  ;;  %v4195_v5 = vld [vmem:[%s5974_s1 + $0x7d4] ss:$8 sps:$4 sm:$0xff]  }
  0xb3   :  { %2587 = vmatpush2.bf16.msra.mxu0 %v4106_v6  ;;  %v4190_v6 = vld [vmem:[%s5974_s1 + $0x6d0] ss:$8 sps:$4 sm:$0xff]  }
  0xb4   :  { %2628 = vmatpush2.bf16.msra.mxu1 %v4109_v7  ;;  %2588 = vmatprep.subr.bf16.mxu0 %v4114_v8  ;;  %v4193_v7 = vld [vmem:[%s5974_s1 + $0x7d0] ss:$8 sps:$4 sm:$0xff]   ;;  %v4198_v8 = vld [vmem:[%s5974_s1 + $0x6c4] ss:$8 sps:$4 sm:$0xff]  }
  0xb5   :  { %2629 = vmatprep.subr.bf16.mxu1 %v4117_v9  ;;  %v4201_v9 = vld [vmem:[%s5974_s1 + $0x7c4] ss:$8 sps:$4 sm:$0xff]  }
  0xb7   :  { %2589 = vmatpush2.bf16.msra.mxu0 %v4112_v10  ;;  %v4196_v10 = vld [vmem:[%s5974_s1 + $0x6c0] ss:$8 sps:$4 sm:$0xff]  }
  0xb8   :  { %2630 = vmatpush2.bf16.msra.mxu1 %v4115_v11  ;;  %2590 = vmatprep.subr.bf16.mxu0 %v4120_v12  ;;  %v4199_v11 = vld [vmem:[%s5974_s1 + $0x7c0] ss:$8 sps:$4 sm:$0xff]   ;;  %v4204_v12 = vld [vmem:[%s5974_s1 + $0x6b4] ss:$8 sps:$4 sm:$0xff]  }
  0xb9   :  { %2631 = vmatprep.subr.bf16.mxu1 %v4123_v13  ;;  %v4207_v13 = vld [vmem:[%s5974_s1 + $0x7b4] ss:$8 sps:$4 sm:$0xff]  }
  0xbb   :  { %2591 = vmatpush2.bf16.msra.mxu0 %v4118_v14  ;;  %v4202_v14 = vld [vmem:[%s5974_s1 + $0x6b0] ss:$8 sps:$4 sm:$0xff]  }
  0xbc   :  { %2632 = vmatpush2.bf16.msra.mxu1 %v4121_v15  ;;  %2592 = vmatprep.subr.bf16.mxu0 %v4126_v16  ;;  %v4205_v15 = vld [vmem:[%s5974_s1 + $0x7b0] ss:$8 sps:$4 sm:$0xff]   ;;  %v4210_v16 = vld [vmem:[%s5974_s1 + $0x6a4] ss:$8 sps:$4 sm:$0xff]  }
  0xbd   :  { %2633 = vmatprep.subr.bf16.mxu1 %v4129_v17  ;;  %v4213_v17 = vld [vmem:[%s5974_s1 + $0x7a4] ss:$8 sps:$4 sm:$0xff]  }
  0xbf   :  { %2593 = vmatpush2.bf16.msra.mxu0 %v4124_v18  ;;  %v4208_v18 = vld [vmem:[%s5974_s1 + $0x6a0] ss:$8 sps:$4 sm:$0xff]  }
  0xc0   :  { %2634 = vmatpush2.bf16.msra.mxu1 %v4127_v19  ;;  %2644 = vmatprep.subr.bf16.mxu0 %v4132_v22  ;;  %v4211_v19 = vld [vmem:[%s5974_s1 + $0x7a0] ss:$8 sps:$4 sm:$0xff]   ;;  %v4219_v22 = vld [vmem:[%s5974_s1 + $0x794] ss:$8 sps:$4 sm:$0xff]  }
  0xc1   :  { %2685 = vmatprep.subr.bf16.mxu1 %v4135_v23  ;;  %v4214_v23 = vld [vmem:[%s5974_s1 + $0x690] ss:$8 sps:$4 sm:$0xff]  }
  0xc2   :  { %2595 = vmatmul.mubr.bf16.vlgmr.msra.gmra.mxu0 %v66_v26  ;;  %v4222_v26 = vld [vmem:[%s5974_s1 + $0x684] ss:$8 sps:$4 sm:$0xff]  }
  0xc3   :  { %2636 = vmatmul.mubr.bf16.vlgmr.msra.gmra.mxu1 %v68_v27  ;;  %2645 = vmatpush1.bf16.msra.mxu0 %v4130_v24  ;;  %v4217_v24 = vld [vmem:[%s5974_s1 + $0x790] ss:$8 sps:$4 sm:$0xff]   ;;  %v4225_v27 = vld [vmem:[%s5974_s1 + $0x784] ss:$8 sps:$4 sm:$0xff]  }
  0xc4   :  { %2686 = vmatpush1.bf16.msra.mxu1 %v4133_v29  ;;  %2646 = vmatprep.subr.bf16.mxu0 %v4138_v30  ;;  %v4223_v29 = vld [vmem:[%s5974_s1 + $0x780] ss:$8 sps:$4 sm:$0xff]  }
  0xc5   :  { %2687 = vmatprep.subr.bf16.mxu1 %v4141_v31  ;;  %2676 = vmatprep.mubr.bf16.mxu0 %v71_v32  ;;  %v466_v30 = vld [vmem:[%s5975_s2] sm:$0x3]  ;;  %v5376_v32 = vsub.s32 0, %v469_v25 }
  0xc6   :  { %2717 = vmatprep.mubr.bf16.mxu1 %v73_v33  ;;  %v46_v31 = vld [vmem:[%s5973_s0 + $0x60] sm:$0xff]  ;;  %v48_v33 = vld [vmem:[%s5973_s0 + $0x70] sm:$0xff] }
  0xc7   :  { %2647 = vmatpush1.bf16.msra.mxu0 %v4136_v34  ;;  %v4228_v34 = vld [vmem:[%s5974_s1 + $0x874] ss:$8 sps:$4 sm:$0xff]  }
  0xc8   :  { %2688 = vmatpush1.bf16.msra.mxu1 %v4139_v35  ;;  %2648 = vmatprep.subr.bf16.mxu0 %v4144_v36  ;;  %v4231_v35 = vld [vmem:[%s5974_s1 + $0x974] ss:$8 sps:$4 sm:$0xff]   ;;  %v4226_v36 = vld [vmem:[%s5974_s1 + $0x870] ss:$8 sps:$4 sm:$0xff]  }
  0xc9   :  { %2689 = vmatprep.subr.bf16.mxu1 %v4147_v37  ;;  %v5390_v37 = vsub.s32 1, %v469_v25 }
  0xcb   :  { %2649 = vmatpush1.bf16.msra.mxu0 %v4142_v38  ;;  %v51_v38 = vld [vmem:[%s5973_s0 + $0x88] sm:$0xff] }
  0xcc   :  { %2690 = vmatpush1.bf16.msra.mxu1 %v4145_v39  ;;  %2650 = vmatprep.subr.bf16.mxu0 %v4150_v40  ;;  %v70_v39 = vpack.c.bf16 %v46_v31, %v46_v31  ;;  %v72_v40 = vpack.c.bf16 %v48_v33, %v48_v33 }
  0xcd   :  { %2691 = vmatprep.subr.bf16.mxu1 %v4153_v41  ;;  %v53_v41 = vld [vmem:[%s5973_s0 + $0x98] sm:$0xff] }
  0xcf   :  { %2651 = vmatpush1.bf16.msra.mxu0 %v4148_v42  ;;  %v471_v42 = vrot.slane %v466_v30, %v5376_v32 }
  0xd0   :  { %2692 = vmatpush1.bf16.msra.mxu1 %v4151_v43  ;;  %2652 = vmatprep.subr.bf16.mxu0 %v4156_v44  ;;  %v4229_v43 = vld [vmem:[%s5974_s1 + $0x970] ss:$8 sps:$4 sm:$0xff]   ;;  %v4234_v44 = vld [vmem:[%s5974_s1 + $0x864] ss:$8 sps:$4 sm:$0xff]  }
  0xd1   :  { %2693 = vmatprep.subr.bf16.mxu1 %v4159_v45  ;;  %v4237_v45 = vld [vmem:[%s5974_s1 + $0x964] ss:$8 sps:$4 sm:$0xff]  }
  0xd3   :  { %2653 = vmatpush1.bf16.msra.mxu0 %v4154_v46  ;;  %v475_v46 = vrot.slane %v466_v30, %v5390_v37 }
  0xd4   :  { %2694 = vmatpush1.bf16.msra.mxu1 %v4157_v47  ;;  %2654 = vmatprep.subr.bf16.mxu0 %v4162_v48  ;;  %v75_v47 = vpack.c.bf16 %v51_v38, %v51_v38  ;;  %v77_v48 = vpack.c.bf16 %v53_v41, %v53_v41 }
  0xd5   :  { %2695 = vmatprep.subr.bf16.mxu1 %v4165_v49 }
  0xd7   :  { %2655 = vmatpush1.bf16.msra.mxu0 %v4160_v50 }
  0xd8   :  { %2696 = vmatpush1.bf16.msra.mxu1 %v4163_v51  ;;  %2656 = vmatprep.subr.bf16.mxu0 %v4168_v52  ;;  %v4232_v51 = vld [vmem:[%s5974_s1 + $0x860] ss:$8 sps:$4 sm:$0xff]  }
  0xd9   :  { %2697 = vmatprep.subr.bf16.mxu1 %v4171_v53  ;;  %v4235_v53 = vld [vmem:[%s5974_s1 + $0x960] ss:$8 sps:$4 sm:$0xff]  }
  0xdb   :  { %2657 = vmatpush1.bf16.msra.mxu0 %v4166_v54 }
  0xdc   :  { %2698 = vmatpush1.bf16.msra.mxu1 %v4169_v55  ;;  %2658 = vmatprep.subr.bf16.mxu0 %v4174_v56  ;;  %v4240_v56 = vld [vmem:[%s5974_s1 + $0x854] ss:$8 sps:$4 sm:$0xff]  }
  0xdd   :  { %2699 = vmatprep.subr.bf16.mxu1 %v4177_v57  ;;  %v4243_v57 = vld [vmem:[%s5974_s1 + $0x954] ss:$8 sps:$4 sm:$0xff]  }
  0xdf   :  { %2659 = vmatpush1.bf16.msra.mxu0 %v4172_v58 }
  0xe0   :  { %2700 = vmatpush1.bf16.msra.mxu1 %v4175_v59  ;;  %2660 = vmatprep.subr.bf16.mxu0 %v4180_v60 }
  0xe1   :  { %2701 = vmatprep.subr.bf16.mxu1 %v4183_v61 }
  0xe3   :  { %2661 = vmatpush2.bf16.msra.mxu0 %v4178_v62  ;;  %v4238_v62 = vld [vmem:[%s5974_s1 + $0x850] ss:$8 sps:$4 sm:$0xff]  }
  0xe4   :  { %2702 = vmatpush2.bf16.msra.mxu1 %v4181_v63  ;;  %2662 = vmatprep.subr.bf16.mxu0 %v4186_v0  ;;  %v4241_v63 = vld [vmem:[%s5974_s1 + $0x950] ss:$8 sps:$4 sm:$0xff]   ;;  %v4246_v0 = vld [vmem:[%s5974_s1 + $0x844] ss:$8 sps:$4 sm:$0xff]  }
  0xe5   :  { %2703 = vmatprep.subr.bf16.mxu1 %v4189_v1 }
  0xe7   :  { %2663 = vmatpush2.bf16.msra.mxu0 %v4184_v2  ;;  %v4249_v2 = vld [vmem:[%s5974_s1 + $0x944] ss:$8 sps:$4 sm:$0xff]  }
  0xe8   :  { %2704 = vmatpush2.bf16.msra.mxu1 %v4187_v3  ;;  %2664 = vmatprep.subr.bf16.mxu0 %v4192_v4 }
  0xe9   :  { %2705 = vmatprep.subr.bf16.mxu1 %v4195_v5  ;;  %v4244_v5 = vld [vmem:[%s5974_s1 + $0x840] ss:$8 sps:$4 sm:$0xff]  }
  0xeb   :  { %2665 = vmatpush2.bf16.msra.mxu0 %v4190_v6  ;;  %v4247_v6 = vld [vmem:[%s5974_s1 + $0x940] ss:$8 sps:$4 sm:$0xff]  }
  0xec   :  { %2706 = vmatpush2.bf16.msra.mxu1 %v4193_v7  ;;  %2666 = vmatprep.subr.bf16.mxu0 %v4198_v8  ;;  %v4252_v7 = vld [vmem:[%s5974_s1 + $0x834] ss:$8 sps:$4 sm:$0xff]  }
  0xed   :  { %2707 = vmatprep.subr.bf16.mxu1 %v4201_v9  ;;  %v4255_v8 = vld [vmem:[%s5974_s1 + $0x934] ss:$8 sps:$4 sm:$0xff]   ;;  %v4250_v9 = vld [vmem:[%s5974_s1 + $0x830] ss:$8 sps:$4 sm:$0xff]  }
  0xef   :  { %2667 = vmatpush2.bf16.msra.mxu0 %v4196_v10  ;;  %v4253_v10 = vld [vmem:[%s5974_s1 + $0x930] ss:$8 sps:$4 sm:$0xff]  }
  0xf0   :  { %2708 = vmatpush2.bf16.msra.mxu1 %v4199_v11  ;;  %2668 = vmatprep.subr.bf16.mxu0 %v4204_v12  ;;  %v4258_v11 = vld [vmem:[%s5974_s1 + $0x824] ss:$8 sps:$4 sm:$0xff]  }
  0xf1   :  { %2709 = vmatprep.subr.bf16.mxu1 %v4207_v13  ;;  %v4261_v12 = vld [vmem:[%s5974_s1 + $0x924] ss:$8 sps:$4 sm:$0xff]   ;;  %v4256_v13 = vld [vmem:[%s5974_s1 + $0x820] ss:$8 sps:$4 sm:$0xff]  }
  0xf3   :  { %2669 = vmatpush2.bf16.msra.mxu0 %v4202_v14  ;;  %v4259_v14 = vld [vmem:[%s5974_s1 + $0x920] ss:$8 sps:$4 sm:$0xff]  }
  0xf4   :  { %2710 = vmatpush2.bf16.msra.mxu1 %v4205_v15  ;;  %2670 = vmatprep.subr.bf16.mxu0 %v4210_v16  ;;  %v4264_v15 = vld [vmem:[%s5974_s1 + $0x814] ss:$8 sps:$4 sm:$0xff]  }
  0xf5   :  { %2711 = vmatprep.subr.bf16.mxu1 %v4213_v17  ;;  %v4267_v16 = vld [vmem:[%s5974_s1 + $0x914] ss:$8 sps:$4 sm:$0xff]   ;;  %v4262_v17 = vld [vmem:[%s5974_s1 + $0x810] ss:$8 sps:$4 sm:$0xff]  }
  0xf7   :  { %2671 = vmatpush2.bf16.msra.mxu0 %v4208_v18  ;;  %v4265_v18 = vld [vmem:[%s5974_s1 + $0x910] ss:$8 sps:$4 sm:$0xff]  }
  0xf8   :  { %2712 = vmatpush2.bf16.msra.mxu1 %v4211_v19  ;;  %2672 = vmatprep.subr.bf16.mxu0 %v4216_v21  ;;  %v4270_v19 = vld [vmem:[%s5974_s1 + $0x804] ss:$8 sps:$4 sm:$0xff]  }
  0xf9   :  { %2713 = vmatprep.subr.bf16.mxu1 %v4219_v22 }
  0xfb   :  { %2673 = vmatpush2.bf16.msra.mxu0 %v4214_v23 }
  0xfc   :  { %2714 = vmatpush2.bf16.msra.mxu1 %v4217_v24  ;;  %2674 = vmatprep.subr.bf16.mxu0 %v4222_v26 }
  0xfd   :  { %2715 = vmatprep.subr.bf16.mxu1 %v4225_v27 }
  0xff   :  { %2675 = vmatpush2.bf16.msra.mxu0 %v4220_v28 }
 0x100   :  { %2716 = vmatpush2.bf16.msra.mxu1 %v4223_v29  ;;  %2726 = vmatprep.subr.bf16.mxu0 %v4228_v34 }
 0x101   :  { %2767 = vmatprep.subr.bf16.mxu1 %v4231_v35 }
 0x102   :  { %v2432_v49 = vpop.f32.mrf.mxu0  ;;  %2677 = vmatmul.mubr.bf16.vlgmr.msra.gmra.mxu0 %v70_v39 }
 0x103   :  { %v2473_v50 = vpop.f32.mrf.mxu1  ;;  %2718 = vmatmul.mubr.bf16.vlgmr.msra.gmra.mxu1 %v72_v40  ;;  %v2433_v52 = vadd.f32 %v2432_v49, %v471_v42  ;;  %2727 = vmatpush1.bf16.msra.mxu0 %v4226_v36 }
 0x104   :  { %2768 = vmatpush1.bf16.msra.mxu1 %v4229_v43  ;;  %v2434_v54 = vpop.f32.mrf.mxu0  ;;  %2728 = vmatprep.subr.bf16.mxu0 %v4234_v44 }
 0x105   :  { %v2475_v55 = vpop.f32.mrf.mxu1  ;;  %2769 = vmatprep.subr.bf16.mxu1 %v4237_v45  ;;  %v5421_v58 = vadd.f32 %v2473_v50, %v2433_v52  ;;  %v2435_v59 = vadd.f32 %v2434_v54, %v475_v46  ;;  %2758 = vmatprep.mubr.bf16.mxu0 %v75_v47 }
 0x106   :  { %2799 = vmatprep.mubr.bf16.mxu1 %v77_v48  ;;  %v2436_v60 = vpop.f32.mrf.mxu0 }
 0x107   :  { %v2477_v61 = vpop.f32.mrf.mxu1  ;;  %v5432_v1 = vadd.f32 %v2475_v55, %v2435_v59  ;;  %2729 = vmatpush1.bf16.msra.mxu0 %v4232_v51 }
 0x108   :  { %2770 = vmatpush1.bf16.msra.mxu1 %v4235_v53  ;;  %v2437_v3 = vpop.f32.mrf.mxu0  ;;  %2730 = vmatprep.subr.bf16.mxu0 %v4240_v56 }
 0x109   :  { %v2478_v4 = vpop.f32.mrf.mxu1  ;;  %2771 = vmatprep.subr.bf16.mxu1 %v4243_v57 }
 0x10b   :  { %2731 = vmatpush1.bf16.msra.mxu0 %v4238_v62 }
 0x10c   :  { %2772 = vmatpush1.bf16.msra.mxu1 %v4241_v63  ;;  %2732 = vmatprep.subr.bf16.mxu0 %v4246_v0 }
 0x10d   :  { %2773 = vmatprep.subr.bf16.mxu1 %v4249_v2 }
 0x10f   :  { %2733 = vmatpush1.bf16.msra.mxu0 %v4244_v5 }
 0x110   :  { %2774 = vmatpush1.bf16.msra.mxu1 %v4247_v6  ;;  %2734 = vmatprep.subr.bf16.mxu0 %v4252_v7 }
 0x111   :  { %2775 = vmatprep.subr.bf16.mxu1 %v4255_v8 }
 0x113   :  { %2735 = vmatpush1.bf16.msra.mxu0 %v4250_v9 }
 0x114   :  { %2776 = vmatpush1.bf16.msra.mxu1 %v4253_v10  ;;  %2736 = vmatprep.subr.bf16.mxu0 %v4258_v11 }
 0x115   :  { %2777 = vmatprep.subr.bf16.mxu1 %v4261_v12 }
 0x117   :  { %2737 = vmatpush1.bf16.msra.mxu0 %v4256_v13 }
 0x118   :  { %2778 = vmatpush1.bf16.msra.mxu1 %v4259_v14  ;;  %2738 = vmatprep.subr.bf16.mxu0 %v4264_v15 }
 0x119   :  { %2779 = vmatprep.subr.bf16.mxu1 %v4267_v16 }
 0x11a   :  { %14 = vsyncpa [#allocation3], 0  ;;  %v4268_v21 = vld [vmem:[%s5974_s1 + $0x800] ss:$8 sps:$4 sm:$0xff]   ;;  %v4276_v23 = vld [vmem:[%s5974_s1 + $0x8f4] ss:$8 sps:$4 sm:$0xff]  }
 0x11b   :  { %2739 = vmatpush1.bf16.msra.mxu0 %v4262_v17  ;;  %v4271_v22 = vld [vmem:[%s5974_s1 + $0x900] ss:$8 sps:$4 sm:$0xff]   ;;  %v4279_v24 = vld [vmem:[%s5974_s1 + $0x9f4] ss:$8 sps:$4 sm:$0xff]   ;;  %v4274_v25 = vld [vmem:[%s5974_s1 + $0x8f0] ss:$8 sps:$4 sm:$0xff]  }
 0x11c   :  { %2780 = vmatpush1.bf16.msra.mxu1 %v4265_v18  ;;  %2740 = vmatprep.subr.bf16.mxu0 %v4270_v19  ;;  %v4277_v26 = vld [vmem:[%s5974_s1 + $0x9f0] ss:$8 sps:$4 sm:$0xff]   ;;  %v4282_v27 = vld [vmem:[%s5974_s1 + $0x8e4] ss:$8 sps:$4 sm:$0xff]   ;;  %v4280_v29 = vld [vmem:[%s5974_s1 + $0x8e0] ss:$8 sps:$4 sm:$0xff]  }
 0x11d   :  { %2781 = vmatprep.subr.bf16.mxu1 %v4273_v20  ;;  %v4285_v28 = vld [vmem:[%s5974_s1 + $0x9e4] ss:$8 sps:$4 sm:$0xff]   ;;  %v4283_v30 = vld [vmem:[%s5974_s1 + $0x9e0] ss:$8 sps:$4 sm:$0xff]   ;;  %v4288_v31 = vld [vmem:[%s5974_s1 + $0x8d4] ss:$8 sps:$4 sm:$0xff]  }
 0x11e   :  { %v4291_v33 = vld [vmem:[%s5974_s1 + $0x9d4] ss:$8 sps:$4 sm:$0xff]   ;;  %v4286_v34 = vld [vmem:[%s5974_s1 + $0x8d0] ss:$8 sps:$4 sm:$0xff]   ;;  %v4294_v36 = vld [vmem:[%s5974_s1 + $0x8c4] ss:$8 sps:$4 sm:$0xff]  }
 0x11f   :  { %2741 = vmatpush1.bf16.msra.mxu0 %v4268_v21  ;;  %v4289_v35 = vld [vmem:[%s5974_s1 + $0x9d0] ss:$8 sps:$4 sm:$0xff]   ;;  %v4297_v38 = vld [vmem:[%s5974_s1 + $0x9c4] ss:$8 sps:$4 sm:$0xff]   ;;  %v4292_v39 = vld [vmem:[%s5974_s1 + $0x8c0] ss:$8 sps:$4 sm:$0xff]  }
 0x120   :  { %2782 = vmatpush1.bf16.msra.mxu1 %v4271_v22  ;;  %2742 = vmatprep.subr.bf16.mxu0 %v4276_v23  ;;  %v4295_v40 = vld [vmem:[%s5974_s1 + $0x9c0] ss:$8 sps:$4 sm:$0xff]   ;;  %v4300_v41 = vld [vmem:[%s5974_s1 + $0x8b4] ss:$8 sps:$4 sm:$0xff]   ;;  %v4298_v43 = vld [vmem:[%s5974_s1 + $0x8b0] ss:$8 sps:$4 sm:$0xff]  }
 0x121   :  { %2783 = vmatprep.subr.bf16.mxu1 %v4279_v24  ;;  %v4303_v42 = vld [vmem:[%s5974_s1 + $0x9b4] ss:$8 sps:$4 sm:$0xff]   ;;  %v4301_v44 = vld [vmem:[%s5974_s1 + $0x9b0] ss:$8 sps:$4 sm:$0xff]   ;;  %v4306_v45 = vld [vmem:[%s5974_s1 + $0x8a4] ss:$8 sps:$4 sm:$0xff]  }
 0x122   :  { %v4309_v46 = vld [vmem:[%s5974_s1 + $0x9a4] ss:$8 sps:$4 sm:$0xff]   ;;  %v4304_v47 = vld [vmem:[%s5974_s1 + $0x8a0] ss:$8 sps:$4 sm:$0xff]   ;;  %v4312_v49 = vld [vmem:[%s5974_s1 + $0x894] ss:$8 sps:$4 sm:$0xff]  }
 0x123   :  { %2743 = vmatpush2.bf16.msra.mxu0 %v4274_v25  ;;  %v4307_v48 = vld [vmem:[%s5974_s1 + $0x9a0] ss:$8 sps:$4 sm:$0xff]   ;;  %v4315_v50 = vld [vmem:[%s5974_s1 + $0x994] ss:$8 sps:$4 sm:$0xff]   ;;  %v4310_v51 = vld [vmem:[%s5974_s1 + $0x890] ss:$8 sps:$4 sm:$0xff]  }
 0x124   :  { %2784 = vmatpush2.bf16.msra.mxu1 %v4277_v26  ;;  %2744 = vmatprep.subr.bf16.mxu0 %v4282_v27  ;;  %v4313_v52 = vld [vmem:[%s5974_s1 + $0x990] ss:$8 sps:$4 sm:$0xff]   ;;  %v4318_v53 = vld [vmem:[%s5974_s1 + $0x884] ss:$8 sps:$4 sm:$0xff]   ;;  %v4316_v55 = vld [vmem:[%s5974_s1 + $0x880] ss:$8 sps:$4 sm:$0xff]  }
 0x125   :  { %2785 = vmatprep.subr.bf16.mxu1 %v4285_v28  ;;  %v4321_v54 = vld [vmem:[%s5974_s1 + $0x984] ss:$8 sps:$4 sm:$0xff]   ;;  %v4319_v56 = vld [vmem:[%s5974_s1 + $0x980] ss:$8 sps:$4 sm:$0xff]   ;;  %v52_v59 = vld [vmem:[%s5973_s0 + $0x90] sm:$0xff]  ;;  %vm3024_vm0 = vcmask 1042432  }
 0x126   :  { %v50_v57 = vld [vmem:[%s5973_s0 + $0x80] sm:$0xff]  ;;  %v4324_v60 = vld [vmem:[%s5974_s1 + $0xa74] ss:$8 sps:$4 sm:$0xff]   ;;  %v76_v63 = vpack.c.bf16 %v52_v59, %v52_v59  ;;  %v55_v0 = vld [vmem:[%s5973_s0 + $0xa8] sm:$0xff]  ;;  %vm3020_vm1 = vcmask 179200  }
 0x127   :  { %2745 = vmatpush2.bf16.msra.mxu0 %v4280_v29  ;;  %v4327_v61 = vld [vmem:[%s5974_s1 + $0xb74] ss:$8 sps:$4 sm:$0xff]   ;;  %v74_v62 = vpack.c.bf16 %v50_v57, %v50_v57  ;;  %v4322_v3 = vld [vmem:[%s5974_s1 + $0xa70] ss:$8 sps:$4 sm:$0xff]   ;;  %v4330_v5 = vld [vmem:[%s5974_s1 + $0xa64] ss:$8 sps:$4 sm:$0xff]   ;;  %v79_v7 = vpack.c.bf16 %v55_v0, %v55_v0 }
 0x128   :  { %2786 = vmatpush2.bf16.msra.mxu1 %v4283_v30  ;;  %2746 = vmatprep.subr.bf16.mxu0 %v4288_v31  ;;  %v57_v2 = vld [vmem:[%s5973_s0 + $0xb8] sm:$0xff]  ;;  %v4333_v6 = vld [vmem:[%s5974_s1 + $0xb64] ss:$8 sps:$4 sm:$0xff]   ;;  %v4328_v12 = vld [vmem:[%s5974_s1 + $0xa60] ss:$8 sps:$4 sm:$0xff]  }
 0x129   :  { %2787 = vmatprep.subr.bf16.mxu1 %v4291_v33  ;;  %v4325_v4 = vld [vmem:[%s5974_s1 + $0xb70] ss:$8 sps:$4 sm:$0xff]   ;;  %v81_v8 = vpack.c.bf16 %v57_v2, %v57_v2  ;;  %v4331_v13 = vld [vmem:[%s5974_s1 + $0xb60] ss:$8 sps:$4 sm:$0xff]   ;;  %v4336_v16 = vld [vmem:[%s5974_s1 + $0xa54] ss:$8 sps:$4 sm:$0xff]  }
 0x12a   :  { %v4334_v22 = vld [vmem:[%s5974_s1 + $0xa50] ss:$8 sps:$4 sm:$0xff]   ;;  %v4345_v26 = vld [vmem:[%s5974_s1 + $0xb44] ss:$8 sps:$4 sm:$0xff]   ;;  %v4340_v27 = vld [vmem:[%s5974_s1 + $0xa40] ss:$8 sps:$4 sm:$0xff]  }
 0x12b   :  { %2747 = vmatpush2.bf16.msra.mxu0 %v4286_v34  ;;  %v4337_v23 = vld [vmem:[%s5974_s1 + $0xb50] ss:$8 sps:$4 sm:$0xff]   ;;  %v4343_v28 = vld [vmem:[%s5974_s1 + $0xb40] ss:$8 sps:$4 sm:$0xff]   ;;  %v4348_v29 = vld [vmem:[%s5974_s1 + $0xa34] ss:$8 sps:$4 sm:$0xff]  }
 0x12c   :  { %2788 = vmatpush2.bf16.msra.mxu1 %v4289_v35  ;;  %2748 = vmatprep.subr.bf16.mxu0 %v4294_v36  ;;  %v4351_v30 = vld [vmem:[%s5974_s1 + $0xb34] ss:$8 sps:$4 sm:$0xff]   ;;  %v4346_v31 = vld [vmem:[%s5974_s1 + $0xa30] ss:$8 sps:$4 sm:$0xff]   ;;  %v4354_v34 = vld [vmem:[%s5974_s1 + $0xa24] ss:$8 sps:$4 sm:$0xff]  }
 0x12d   :  { %2789 = vmatprep.subr.bf16.mxu1 %v4297_v38  ;;  %v4349_v33 = vld [vmem:[%s5974_s1 + $0xb30] ss:$8 sps:$4 sm:$0xff]   ;;  %v4357_v35 = vld [vmem:[%s5974_s1 + $0xb24] ss:$8 sps:$4 sm:$0xff]   ;;  %v4352_v36 = vld [vmem:[%s5974_s1 + $0xa20] ss:$8 sps:$4 sm:$0xff]  }
 0x12e   :  { %v4355_v38 = vld [vmem:[%s5974_s1 + $0xb20] ss:$8 sps:$4 sm:$0xff]   ;;  %v4382_v57 = vld [vmem:[%s5974_s1 + $0xad0] ss:$8 sps:$4 sm:$0xff]   ;;  %v4396_v0 = vld [vmem:[%s5974_s1 + $0xab4] ss:$8 sps:$4 sm:$0xff]  }
 0x12f   :  { %2749 = vmatpush2.bf16.msra.mxu0 %v4292_v39  ;;  %v4360_v39 = vld [vmem:[%s5974_s1 + $0xa14] ss:$8 sps:$4 sm:$0xff]   ;;  %v4385_v59 = vld [vmem:[%s5974_s1 + $0xbd0] ss:$8 sps:$4 sm:$0xff]  }
 0x130   :  { %2790 = vmatpush2.bf16.msra.mxu1 %v4295_v40  ;;  %2750 = vmatprep.subr.bf16.mxu0 %v4300_v41  ;;  %v4363_v40 = vld [vmem:[%s5974_s1 + $0xb14] ss:$8 sps:$4 sm:$0xff]   ;;  %v4358_v41 = vld [vmem:[%s5974_s1 + $0xa10] ss:$8 sps:$4 sm:$0xff]  }
 0x131   :  { %2791 = vmatprep.subr.bf16.mxu1 %v4303_v42  ;;  %v4361_v42 = vld [vmem:[%s5974_s1 + $0xb10] ss:$8 sps:$4 sm:$0xff]   ;;  %v4399_v2 = vld [vmem:[%s5974_s1 + $0xbb4] ss:$8 sps:$4 sm:$0xff]  }
 0x133   :  { %2751 = vmatpush2.bf16.msra.mxu0 %v4298_v43  ;;  %v4366_v43 = vld [vmem:[%s5974_s1 + $0xa04] ss:$8 sps:$4 sm:$0xff]  }
 0x134   :  { %2792 = vmatpush2.bf16.msra.mxu1 %v4301_v44  ;;  %2752 = vmatprep.subr.bf16.mxu0 %v4306_v45  ;;  %v4369_v44 = vld [vmem:[%s5974_s1 + $0xb04] ss:$8 sps:$4 sm:$0xff]   ;;  %v4364_v45 = vld [vmem:[%s5974_s1 + $0xa00] ss:$8 sps:$4 sm:$0xff]  }
 0x135   :  { %2793 = vmatprep.subr.bf16.mxu1 %v4309_v46  ;;  %v4367_v46 = vld [vmem:[%s5974_s1 + $0xb00] ss:$8 sps:$4 sm:$0xff]  }
 0x137   :  { %2753 = vmatpush2.bf16.msra.mxu0 %v4304_v47  ;;  %v4372_v47 = vld [vmem:[%s5974_s1 + $0xaf4] ss:$8 sps:$4 sm:$0xff]  }
 0x138   :  { %2794 = vmatpush2.bf16.msra.mxu1 %v4307_v48  ;;  %2754 = vmatprep.subr.bf16.mxu0 %v4312_v49  ;;  %v4375_v48 = vld [vmem:[%s5974_s1 + $0xbf4] ss:$8 sps:$4 sm:$0xff]   ;;  %v4370_v49 = vld [vmem:[%s5974_s1 + $0xaf0] ss:$8 sps:$4 sm:$0xff]  }
 0x139   :  { %2795 = vmatprep.subr.bf16.mxu1 %v4315_v50  ;;  %v4373_v50 = vld [vmem:[%s5974_s1 + $0xbf0] ss:$8 sps:$4 sm:$0xff]  }
 0x13b   :  { %2755 = vmatpush2.bf16.msra.mxu0 %v4310_v51  ;;  %v4378_v51 = vld [vmem:[%s5974_s1 + $0xae4] ss:$8 sps:$4 sm:$0xff]  }
 0x13c   :  { %2796 = vmatpush2.bf16.msra.mxu1 %v4313_v52  ;;  %2756 = vmatprep.subr.bf16.mxu0 %v4318_v53  ;;  %v4381_v52 = vld [vmem:[%s5974_s1 + $0xbe4] ss:$8 sps:$4 sm:$0xff]   ;;  %v4376_v53 = vld [vmem:[%s5974_s1 + $0xae0] ss:$8 sps:$4 sm:$0xff]  }
 0x13d   :  { %2797 = vmatprep.subr.bf16.mxu1 %v4321_v54  ;;  %v4379_v54 = vld [vmem:[%s5974_s1 + $0xbe0] ss:$8 sps:$4 sm:$0xff]  }
 0x13f   :  { %2757 = vmatpush2.bf16.msra.mxu0 %v4316_v55  ;;  %v4384_v55 = vld [vmem:[%s5974_s1 + $0xad4] ss:$8 sps:$4 sm:$0xff]  }
 0x140   :  { %2798 = vmatpush2.bf16.msra.mxu1 %v4319_v56  ;;  %2808 = vmatprep.subr.bf16.mxu0 %v4324_v60  ;;  %v4387_v56 = vld [vmem:[%s5974_s1 + $0xbd4] ss:$8 sps:$4 sm:$0xff]   ;;  %v4390_v60 = vld [vmem:[%s5974_s1 + $0xac4] ss:$8 sps:$4 sm:$0xff]  }
 0x141   :  { %2849 = vmatprep.subr.bf16.mxu1 %v4327_v61  ;;  %v4393_v61 = vld [vmem:[%s5974_s1 + $0xbc4] ss:$8 sps:$4 sm:$0xff]  }
 0x142   :  { %v2514_v9 = vpop.f32.mrf.mxu0  ;;  %2759 = vmatmul.mubr.bf16.vlgmr.msra.gmra.mxu0 %v74_v62  ;;  %v4388_v62 = vld [vmem:[%s5974_s1 + $0xac0] ss:$8 sps:$4 sm:$0xff]  }
 0x143   :  { %v2555_v10 = vpop.f32.mrf.mxu1  ;;  %2800 = vmatmul.mubr.bf16.vlgmr.msra.gmra.mxu1 %v76_v63  ;;  %v2515_v11 = vadd.f32 %v2514_v9, %v5421_v58  ;;  %2809 = vmatpush1.bf16.msra.mxu0 %v4322_v3  ;;  %v4339_v58 = vld [vmem:[%s5974_s1 + $0xb54] ss:$8 sps:$4 sm:$0xff]   ;;  %v4391_v63 = vld [vmem:[%s5974_s1 + $0xbc0] ss:$8 sps:$4 sm:$0xff]   ;;  %v4394_v3 = vld [vmem:[%s5974_s1 + $0xab0] ss:$8 sps:$4 sm:$0xff]  }
 0x144   :  { %2850 = vmatpush1.bf16.msra.mxu1 %v4325_v4  ;;  %v2516_v14 = vpop.f32.mrf.mxu0  ;;  %2810 = vmatprep.subr.bf16.mxu0 %v4330_v5  ;;  %v4397_v4 = vld [vmem:[%s5974_s1 + $0xbb0] ss:$8 sps:$4 sm:$0xff]   ;;  %v4402_v5 = vld [vmem:[%s5974_s1 + $0xaa4] ss:$8 sps:$4 sm:$0xff]   ;;  %v4408_v9 = vld [vmem:[%s5974_s1 + $0xa94] ss:$8 sps:$4 sm:$0xff]  }
 0x145   :  { %v2557_v15 = vpop.f32.mrf.mxu1  ;;  %2851 = vmatprep.subr.bf16.mxu1 %v4333_v6  ;;  %v5630_v17 = vadd.f32 %v2555_v10, %v2515_v11  ;;  %v2517_v18 = vadd.f32 %v2516_v14, %v5432_v1  ;;  %2840 = vmatprep.mubr.bf16.mxu0 %v79_v7  ;;  %v4342_v1 = vld [vmem:[%s5974_s1 + $0xa44] ss:$8 sps:$4 sm:$0xff]   ;;  %v4400_v7 = vld [vmem:[%s5974_s1 + $0xaa0] ss:$8 sps:$4 sm:$0xff]   ;;  %v4411_v10 = vld [vmem:[%s5974_s1 + $0xb94] ss:$8 sps:$4 sm:$0xff]  }
 0x146   :  { %2881 = vmatprep.mubr.bf16.mxu1 %v81_v8  ;;  %v2518_v19 = vpop.f32.mrf.mxu0  ;;  %v4405_v6 = vld [vmem:[%s5974_s1 + $0xba4] ss:$8 sps:$4 sm:$0xff]   ;;  %v4403_v8 = vld [vmem:[%s5974_s1 + $0xba0] ss:$8 sps:$4 sm:$0xff]   ;;  %v4406_v11 = vld [vmem:[%s5974_s1 + $0xa90] ss:$8 sps:$4 sm:$0xff]  }
 0x147   :  { %v2559_v20 = vpop.f32.mrf.mxu1  ;;  %v5633_v21 = vadd.f32 %v2557_v15, %v2517_v18  ;;  %2811 = vmatpush1.bf16.msra.mxu0 %v4328_v12  ;;  %v4409_v12 = vld [vmem:[%s5974_s1 + $0xb90] ss:$8 sps:$4 sm:$0xff]   ;;  %v4417_v14 = vld [vmem:[%s5974_s1 + $0xb84] ss:$8 sps:$4 sm:$0xff]   ;;  %v4412_v15 = vld [vmem:[%s5974_s1 + $0xa80] ss:$8 sps:$4 sm:$0xff]  }
 0x148   :  { %2852 = vmatpush1.bf16.msra.mxu1 %v4331_v13  ;;  %v2519_v24 = vpop.f32.mrf.mxu0  ;;  %2812 = vmatprep.subr.bf16.mxu0 %v4336_v16  ;;  %v4414_v13 = vld [vmem:[%s5974_s1 + $0xa84] ss:$8 sps:$4 sm:$0xff]   ;;  %v4415_v16 = vld [vmem:[%s5974_s1 + $0xb80] ss:$8 sps:$4 sm:$0xff]   ;;  %v56_v18 = vld [vmem:[%s5973_s0 + $0xb0] sm:$0xff] }
 0x149   :  { %v2560_v25 = vpop.f32.mrf.mxu1  ;;  %2853 = vmatprep.subr.bf16.mxu1 %v4339_v58  ;;  %v54_v58 = vld [vmem:[%s5973_s0 + $0xa0] sm:$0xff]  ;;  %v80_v20 = vpack.c.bf16 %v56_v18, %v56_v18  ;;  %v4465_v18 = vld [vmem:[%s5978_s5 + $0x10] ss:$8 sps:$4 sm:$0xff]  }
 0x14a   :  { %v78_v19 = vpack.c.bf16 %v54_v58, %v54_v58  ;;  %v4467_v58 = vld [vmem:[%s5978_s5 + $0x14] ss:$8 sps:$4 sm:$0xff]  }
 0x14b   :  { %2813 = vmatpush1.bf16.msra.mxu0 %v4334_v22 }
 0x14c   :  { %2854 = vmatpush1.bf16.msra.mxu1 %v4337_v23  ;;  %2814 = vmatprep.subr.bf16.mxu0 %v4342_v1 }
 0x14d   :  { %2855 = vmatprep.subr.bf16.mxu1 %v4345_v26 }
 0x14f   :  { %2815 = vmatpush1.bf16.msra.mxu0 %v4340_v27 }
 0x150   :  { %2856 = vmatpush1.bf16.msra.mxu1 %v4343_v28  ;;  %2816 = vmatprep.subr.bf16.mxu0 %v4348_v29 }
 0x151   :  { %2857 = vmatprep.subr.bf16.mxu1 %v4351_v30 }
 0x153   :  { %2817 = vmatpush1.bf16.msra.mxu0 %v4346_v31 }
 0x154   :  { %2858 = vmatpush1.bf16.msra.mxu1 %v4349_v33  ;;  %2818 = vmatprep.subr.bf16.mxu0 %v4354_v34  ;;  %v4418_v34 = vld [vmem:[%s5976_s3 + $0x70] ss:$8 sps:$4 sm:$0xff]  }
 0x155   :  { %2859 = vmatprep.subr.bf16.mxu1 %v4357_v35  ;;  %v4420_v35 = vld [vmem:[%s5976_s3 + $0x74] ss:$8 sps:$4 sm:$0xff]  }
 0x157   :  { %2819 = vmatpush1.bf16.msra.mxu0 %v4352_v36  ;;  %v4426_v36 = vld [vmem:[%s5976_s3 + $0x54] ss:$8 sps:$4 sm:$0xff]  }
 0x158   :  { %2860 = vmatpush1.bf16.msra.mxu1 %v4355_v38  ;;  %2820 = vmatprep.subr.bf16.mxu0 %v4360_v39  ;;  %v4424_v38 = vld [vmem:[%s5976_s3 + $0x50] ss:$8 sps:$4 sm:$0xff]   ;;  %v4429_v39 = vld [vmem:[%s5976_s3 + $0x44] ss:$8 sps:$4 sm:$0xff]  }
 0x159   :  { %2861 = vmatprep.subr.bf16.mxu1 %v4363_v40  ;;  %v4427_v40 = vld [vmem:[%s5976_s3 + $0x40] ss:$8 sps:$4 sm:$0xff]  }
 0x15b   :  { %2821 = vmatpush1.bf16.msra.mxu0 %v4358_v41  ;;  %v4432_v41 = vld [vmem:[%s5976_s3 + $0x34] ss:$8 sps:$4 sm:$0xff]  }
 0x15c   :  { %2862 = vmatpush1.bf16.msra.mxu1 %v4361_v42  ;;  %2822 = vmatprep.subr.bf16.mxu0 %v4366_v43  ;;  %v4430_v42 = vld [vmem:[%s5976_s3 + $0x30] ss:$8 sps:$4 sm:$0xff]   ;;  %v4435_v43 = vld [vmem:[%s5976_s3 + $0x24] ss:$8 sps:$4 sm:$0xff]  }
 0x15d   :  { %2863 = vmatprep.subr.bf16.mxu1 %v4369_v44  ;;  %v4433_v44 = vld [vmem:[%s5976_s3 + $0x20] ss:$8 sps:$4 sm:$0xff]  }
 0x15f   :  { %2823 = vmatpush1.bf16.msra.mxu0 %v4364_v45  ;;  %v4438_v45 = vld [vmem:[%s5976_s3 + $0x14] ss:$8 sps:$4 sm:$0xff]  }
 0x160   :  { %2864 = vmatpush1.bf16.msra.mxu1 %v4367_v46  ;;  %2824 = vmatprep.subr.bf16.mxu0 %v4372_v47  ;;  %v4436_v46 = vld [vmem:[%s5976_s3 + $0x10] ss:$8 sps:$4 sm:$0xff]   ;;  %v4441_v47 = vld [vmem:[%s5976_s3 + $0x4] ss:$8 sps:$4 sm:$0xff]  }
 0x161   :  { %2865 = vmatprep.subr.bf16.mxu1 %v4375_v48  ;;  %v4439_v48 = vld [vmem:[%s5976_s3] ss:$8 sps:$4 sm:$0xff]  }
 0x163   :  { %2825 = vmatpush2.bf16.msra.mxu0 %v4370_v49 }
 0x164   :  { %2866 = vmatpush2.bf16.msra.mxu1 %v4373_v50  ;;  %2826 = vmatprep.subr.bf16.mxu0 %v4378_v51 }
 0x165   :  { %2867 = vmatprep.subr.bf16.mxu1 %v4381_v52  ;;  %v2912_v52 = vld [vmem:[%s5976_s3 + $0x90] sm:$0x77] }
 0x167   :  { %2827 = vmatpush2.bf16.msra.mxu0 %v4376_v53 }
 0x168   :  { %2868 = vmatpush2.bf16.msra.mxu1 %v4379_v54  ;;  %2828 = vmatprep.subr.bf16.mxu0 %v4384_v55  ;;  %v3803_v55 = vcombine.high %v2912_v52, %v2912_v52 }
 0x169   :  { %2869 = vmatprep.subr.bf16.mxu1 %v4387_v56  ;;  %v3802_v56 = vcombine.low %v2912_v52, %v2912_v52 }
 0x16b   :  { %2829 = vmatpush2.bf16.msra.mxu0 %v4382_v57 }
 0x16c   :  { %2870 = vmatpush2.bf16.msra.mxu1 %v4385_v59  ;;  %2830 = vmatprep.subr.bf16.mxu0 %v4390_v60 }
 0x16d   :  { %2871 = vmatprep.subr.bf16.mxu1 %v4393_v61 }
 0x16f   :  { %2831 = vmatpush2.bf16.msra.mxu0 %v4388_v62  ;;  %v3026_v62 = vsel %vm3024_vm0, %v3802_v56, 0  ;;  %v4508_v56 = vmov 0  }
 0x170   :  { %2872 = vmatpush2.bf16.msra.mxu1 %v4391_v63  ;;  %2832 = vmatprep.subr.bf16.mxu0 %v4396_v0 }
 0x171   :  { %2873 = vmatprep.subr.bf16.mxu1 %v4399_v2 }
 0x173   :  { %2833 = vmatpush2.bf16.msra.mxu0 %v4394_v3  ;;  %v4446_v3 = vld [vmem:[%s5976_s3 + $0x84] ss:$8 sps:$4 sm:$0xff]  }
 0x174   :  { %2874 = vmatpush2.bf16.msra.mxu1 %v4397_v4  ;;  %2834 = vmatprep.subr.bf16.mxu0 %v4402_v5  ;;  %v4444_v4 = vld [vmem:[%s5976_s3 + $0x80] ss:$8 sps:$4 sm:$0xff]   ;;  %v4447_v5 = vld [vmem:[%s5978_s5 + $0x70] ss:$8 sps:$4 sm:$0xff]  }
 0x175   :  { %2875 = vmatprep.subr.bf16.mxu1 %v4405_v6  ;;  %v4449_v6 = vld [vmem:[%s5978_s5 + $0x74] ss:$8 sps:$4 sm:$0xff]  }
 0x177   :  { %2835 = vmatpush2.bf16.msra.mxu0 %v4400_v7  ;;  %v4452_v7 = vld [vmem:[%s5978_s5 + $0x64] ss:$8 sps:$4 sm:$0xff]  }
 0x178   :  { %2876 = vmatpush2.bf16.msra.mxu1 %v4403_v8  ;;  %2836 = vmatprep.subr.bf16.mxu0 %v4408_v9  ;;  %v4450_v8 = vld [vmem:[%s5978_s5 + $0x60] ss:$8 sps:$4 sm:$0xff]   ;;  %v4455_v9 = vld [vmem:[%s5978_s5 + $0x54] ss:$8 sps:$4 sm:$0xff]  }
 0x179   :  { %2877 = vmatprep.subr.bf16.mxu1 %v4411_v10  ;;  %v4453_v10 = vld [vmem:[%s5978_s5 + $0x50] ss:$8 sps:$4 sm:$0xff]  }
 0x17b   :  { %2837 = vmatpush2.bf16.msra.mxu0 %v4406_v11  ;;  %v4458_v11 = vld [vmem:[%s5978_s5 + $0x44] ss:$8 sps:$4 sm:$0xff]  }
 0x17c   :  { %2878 = vmatpush2.bf16.msra.mxu1 %v4409_v12  ;;  %2838 = vmatprep.subr.bf16.mxu0 %v4414_v13  ;;  %v4456_v12 = vld [vmem:[%s5978_s5 + $0x40] ss:$8 sps:$4 sm:$0xff]   ;;  %v4461_v13 = vld [vmem:[%s5978_s5 + $0x34] ss:$8 sps:$4 sm:$0xff]  }
 0x17d   :  { %2879 = vmatprep.subr.bf16.mxu1 %v4417_v14  ;;  %v4459_v14 = vld [vmem:[%s5978_s5 + $0x30] ss:$8 sps:$4 sm:$0xff]  }
 0x17f   :  { %2839 = vmatpush2.bf16.msra.mxu0 %v4412_v15  ;;  %v4464_v15 = vld [vmem:[%s5978_s5 + $0x24] ss:$8 sps:$4 sm:$0xff]  }
 0x180   :  { %2880 = vmatpush2.bf16.msra.mxu1 %v4415_v16  ;;  %3031 = vmatprep.subr.bf16.mxu0 %v4420_v35  ;;  %v4462_v16 = vld [vmem:[%s5978_s5 + $0x20] ss:$8 sps:$4 sm:$0xff]  }
 0x181   :  { %3211 = vmatprep.subr.bf16.mxu1 %v4449_v6 }
 0x182   :  { %v2596_v22 = vpop.f32.mrf.mxu0  ;;  %2841 = vmatmul.mubr.bf16.vlgmr.msra.gmra.mxu0 %v78_v19  ;;  %v4470_v19 = vld [vmem:[%s5978_s5 + $0x4] ss:$8 sps:$4 sm:$0xff]  }
 0x183   :  { %v2637_v23 = vpop.f32.mrf.mxu1  ;;  %2882 = vmatmul.mubr.bf16.vlgmr.msra.gmra.mxu1 %v80_v20  ;;  %v2597_v24 = vadd.f32 %v2596_v22, %v5630_v17  ;;  %v4423_v17 = vld [vmem:[%s5976_s3 + $0x64] ss:$8 sps:$4 sm:$0xff]   ;;  %3032 = vmatpush1.bf16.msra.mxu0 %v4418_v34  ;;  %v4468_v20 = vld [vmem:[%s5978_s5] ss:$8 sps:$4 sm:$0xff]  }
 0x184   :  { %v2598_v25 = vpop.f32.mrf.mxu0  ;;  %3033 = vmatprep.subr.bf16.mxu0 %v4423_v17  ;;  %3212 = vmatpush1.bf16.msra.mxu1 %v4447_v5 }
 0x185   :  { %v2639_v1 = vpop.f32.mrf.mxu1  ;;  %v2638_v26 = vadd.f32 %v2637_v23, %v2597_v24  ;;  %v2599_v27 = vadd.f32 %v2598_v25, %v5633_v21  ;;  %v4421_v21 = vld [vmem:[%s5976_s3 + $0x60] ss:$8 sps:$4 sm:$0xff]   ;;  %3213 = vmatprep.subr.bf16.mxu1 %v4452_v7 }
 0x186   :  { %v2600_v28 = vpop.f32.mrf.mxu0 }
 0x187   :  { %v2641_v29 = vpop.f32.mrf.mxu1  ;;  %v2640_v30 = vadd.f32 %v2639_v1, %v2599_v27  ;;  %3034 = vmatpush1.bf16.msra.mxu0 %v4421_v21 }
 0x188   :  { %v2601_v31 = vpop.f32.mrf.mxu0  ;;  %3035 = vmatprep.subr.bf16.mxu0 %v4426_v36  ;;  %3214 = vmatpush1.bf16.msra.mxu1 %v4450_v8 }
 0x189   :  { %v2642_v33 = vpop.f32.mrf.mxu1  ;;  %3215 = vmatprep.subr.bf16.mxu1 %v4455_v9 }
 0x18b   :  { %3036 = vmatpush1.bf16.msra.mxu0 %v4424_v38 }
 0x18c   :  { %3037 = vmatprep.subr.bf16.mxu0 %v4429_v39  ;;  %3216 = vmatpush1.bf16.msra.mxu1 %v4453_v10 }
 0x18d   :  { %3217 = vmatprep.subr.bf16.mxu1 %v4458_v11 }
 0x18f   :  { %3038 = vmatpush1.bf16.msra.mxu0 %v4427_v40 }
 0x190   :  { %3039 = vmatprep.subr.bf16.mxu0 %v4432_v41  ;;  %3218 = vmatpush1.bf16.msra.mxu1 %v4456_v12 }
 0x191   :  { %3219 = vmatprep.subr.bf16.mxu1 %v4461_v13 }
 0x193   :  { %3040 = vmatpush1.bf16.msra.mxu0 %v4430_v42 }
 0x194   :  { %3041 = vmatprep.subr.bf16.mxu0 %v4435_v43  ;;  %3220 = vmatpush1.bf16.msra.mxu1 %v4459_v14 }
 0x195   :  { %3221 = vmatprep.subr.bf16.mxu1 %v4464_v15  ;;  %v4484_v15 = vld [vmem:[%s5980_s7 + $0x48] ss:$0 sps:$4 sm:$0x77]  }
 0x197   :  { %3042 = vmatpush1.bf16.msra.mxu0 %v4433_v44 }
 0x198   :  { %3043 = vmatprep.subr.bf16.mxu0 %v4438_v45  ;;  %3222 = vmatpush1.bf16.msra.mxu1 %v4462_v16  ;;  %v3343_v16 = vsel %vm3024_vm0, %v4484_v15, 0 }
 0x199   :  { %3223 = vmatprep.subr.bf16.mxu1 %v4467_v58  ;;  %v4485_v58 = vld [vmem:[%s5980_s7 + $0x40] sm:$0xff]  }
 0x19b   :  { %3044 = vmatpush1.bf16.msra.mxu0 %v4436_v46 }
 0x19c   :  { %3045 = vmatprep.subr.bf16.mxu0 %v4441_v47  ;;  %3224 = vmatpush1.bf16.msra.mxu1 %v4465_v18  ;;  %v3095_v18 = vld [vmem:[%s5979_s6] sm:$0x3]  ;;  %s4509_s6 = smov [#allocation2]  }
 0x19d   :  { %3225 = vmatprep.subr.bf16.mxu1 %v4470_v19  ;;  %v3100_v19 = vrot.slane %v3095_v18, %v5376_v32  ;;  %s3392_s0 = sshll.u32 %s4509_s6, 4  ;;  %s3393_s0 = int_to_ptr.vmem [resolvable:$true] %s3392_s0 }
 0x19e   :  { %s4486_s1 = scalar_lea.vmem %s3393_s0, 128  ;;  %p4491_p1 = scmp.lt.s32.totalorder %s3393_s0, %s3393_s0 }
 0x19f   :  { %3046 = vmatpush1.bf16.msra.mxu0 %v4439_v48  ;;  %p4487_p0 = scmp.ne.s32.totalorder %s3393_s0, %s4486_s1  ;;  %p4492_p2 = scmp.lt.s32.totalorder %s4486_s1, %s4486_s1 }
 0x1a0   :  { %3804 = vmatprep.subr.msk.bf16.mxu0 %vm3024_vm0, %v3803_v55  ;;  %3226 = vmatpush1.bf16.msra.mxu1 %v4468_v20  ;;  %v4476_v55 = vld [vmem:[%s5980_s7 + $0x38] sm:$0xff]   ;;  %v3104_v20 = vrot.slane %v3095_v18, %v5390_v37 }
 0x1a1   :  { %p4493_p3 = por %p4492_p2, %p4491_p1 }
 0x1a3   :  { %3060 = vmatpush2.bf16.msra.mxu0 %v3026_v62  ;;  %v4481_v62 = vld [vmem:[%s5980_s7 + $0x10] sm:$0xff]   ;;  %p4494_p4 = pnand %p4493_p3, %p4487_p0 }
 0x1a4   :  { %3061 = vmatprep.subr.bf16.mxu0 %v4446_v3 }
 0x1a7   :  { %3062 = vmatpush2.bf16.msra.mxu0 %v4444_v4 }
 0x1a8   :  { %3345 = vmatprep.subr.bf16.mxu0 %v4508_v56 }
 0x1c2   :  { %v2678_v49 = vpop.f32.mrf.mxu0 }
 0x1c3   :  { %v2719_v50 = vpop.f32.mrf.mxu1  ;;  %v2679_v51 = vadd.f32 %v2678_v49, %v2638_v26  ;;  %v3094_v49 = vld [vmem:[%s5978_s5 + $0x90] sm:$0x77] }
 0x1c4   :  { %v2680_v53 = vpop.f32.mrf.mxu0 }
 0x1c5   :  { %v2721_v54 = vpop.f32.mrf.mxu1  ;;  %v2720_v57 = vadd.f32 %v2719_v50, %v2679_v51  ;;  %v2681_v59 = vadd.f32 %v2680_v53, %v2640_v30  ;;  %v3825_v50 = vcombine.high %v3094_v49, %v3094_v49  ;;  %v3824_v51 = vcombine.low %v3094_v49, %v3094_v49  ;;  %v4475_v53 = vld [vmem:[%s5978_s5 + $0x84] ss:$8 sps:$4 sm:$0xff]  }
 0x1c6   :  { %v2682_v60 = vpop.f32.mrf.mxu0 }
 0x1c7   :  { %v2723_v61 = vpop.f32.mrf.mxu1  ;;  %v2722_v63 = vadd.f32 %v2721_v54, %v2681_v59  ;;  %3826 = vmatprep.subr.msk.bf16.mxu1 %vm3024_vm0, %v3825_v50  ;;  %v3206_v52 = vsel %vm3024_vm0, %v3824_v51, 0  ;;  %v4473_v54 = vld [vmem:[%s5978_s5 + $0x80] ss:$8 sps:$4 sm:$0xff]  }
 0x1c8   :  { %v2683_v0 = vpop.f32.mrf.mxu0  ;;  %3240 = vmatpush2.bf16.msra.mxu1 %v3206_v52  ;;  %v4478_v59 = vld [vmem:[%s5980_s7 + $0x28] sm:$0xff]   ;;  %v4479_v60 = vld [vmem:[%s5980_s7 + $0x20] sm:$0xff]   ;;  %v4480_v61 = vld [vmem:[%s5980_s7 + $0x18] sm:$0xff]  }
 0x1c9   :  { %v2724_v2 = vpop.f32.mrf.mxu1  ;;  %3241 = vmatprep.subr.bf16.mxu1 %v4475_v53  ;;  %v4483_v0 = vld [vmem:[%s5980_s7] sm:$0xff]  }
 0x1ca   :  { %v2913_v2 = vld [vmem:[%s5977_s4] sm:$0x3] }
 0x1cb   :  { %v2918_v3 = vrot.slane %v2913_v2, %v5376_v32  ;;  %v2922_v4 = vrot.slane %v2913_v2, %v5390_v37 }
 0x1cc   :  { %3242 = vmatpush2.bf16.msra.mxu1 %v4473_v54 }
 0x202   :  { %v2760_v22 = vpop.f32.mrf.mxu0 }
 0x203   :  { %v2801_v23 = vpop.f32.mrf.mxu1  ;;  %v2761_v24 = vadd.f32 %v2760_v22, %v2720_v57  ;;  %v4477_v57 = vld [vmem:[%s5980_s7 + $0x30] sm:$0xff]  }
 0x204   :  { %v2762_v25 = vpop.f32.mrf.mxu0 }
 0x205   :  { %v2803_v1 = vpop.f32.mrf.mxu1  ;;  %v2802_v26 = vadd.f32 %v2801_v23, %v2761_v24  ;;  %v2763_v31 = vadd.f32 %v2762_v25, %v2722_v63  ;;  %v4482_v63 = vld [vmem:[%s5980_s7 + $0x8] sm:$0xff]  }
 0x206   :  { %v2764_v27 = vpop.f32.mrf.mxu0 }
 0x207   :  { %v2805_v28 = vpop.f32.mrf.mxu1  ;;  %v2804_v35 = vadd.f32 %v2803_v1, %v2763_v31  ;;  %v3828_v31 = vld [vmem:[%s5981_s8] ss:$0 sm:$0xff] }
 0x208   :  { %v2765_v29 = vpop.f32.mrf.mxu0 }
 0x209   :  { %v2806_v30 = vpop.f32.mrf.mxu1 }
 0x242   :  { %v2842_v33 = vpop.f32.mrf.mxu0 }
 0x243   :  { %v2883_v34 = vpop.f32.mrf.mxu1  ;;  %v2843_v17 = vadd.f32 %v2842_v33, %v2802_v26 }
 0x244   :  { %v2844_v21 = vpop.f32.mrf.mxu0 }
 0x245   :  { %v2885_v36 = vpop.f32.mrf.mxu1  ;;  %v2884_v38 = vadd.f32 %v2883_v34, %v2843_v17  ;;  %v2845_v39 = vadd.f32 %v2844_v21, %v2804_v35 }
 0x246   :  { %v2846_v40 = vpop.f32.mrf.mxu0 }
 0x247   :  { %v2887_v41 = vpop.f32.mrf.mxu1  ;;  %v2886_v42 = vadd.f32 %v2885_v36, %v2845_v39  ;;  %v2890_v43 = vmax.f32 %v2884_v38, 0.0 }
 0x248   :  { %v2847_v44 = vpop.f32.mrf.mxu0 }
 0x249   :  { %v2888_v45 = vpop.f32.mrf.mxu1  ;;  %v2891_v46 = vmax.f32 %v2886_v42, 0.0  ;;  %v2892_v48 = vpack.c.bf16 %v2890_v43, %v2890_v43 }
 0x24b   :  { %v2893_v47 = vpack.c.bf16 %v2891_v46, %v2891_v46 }
 0x24d   :  { %3805 = vmatprep.mubr.msk.bf16.mxu0 %vm3020_vm1, %v2893_v47 }
 0x24e   :  { %3064 = vmatmul.mubr.bf16.vlgmr.msra.gmra.mxu0 %v2892_v48 }
 0x24f   :  { %3346 = vmatpush1.bf16.msra.mxu0 %v4476_v55 }
 0x250   :  { %3347 = vmatprep.subr.bf16.mxu0 %v4508_v56 }
 0x253   :  { %3348 = vmatpush1.bf16.msra.mxu0 %v4477_v57 }
 0x254   :  { %3349 = vmatprep.subr.bf16.mxu0 %v4508_v56 }
 0x257   :  { %3350 = vmatpush1.bf16.msra.mxu0 %v4478_v59 }
 0x258   :  { %3351 = vmatprep.subr.bf16.mxu0 %v4508_v56 }
 0x25b   :  { %3352 = vmatpush1.bf16.msra.mxu0 %v4479_v60 }
 0x25c   :  { %3353 = vmatprep.subr.bf16.mxu0 %v4508_v56 }
 0x25f   :  { %3354 = vmatpush1.bf16.msra.mxu0 %v4480_v61 }
 0x260   :  { %3355 = vmatprep.subr.bf16.mxu0 %v4508_v56 }
 0x263   :  { %3356 = vmatpush1.bf16.msra.mxu0 %v4481_v62 }
 0x264   :  { %3357 = vmatprep.subr.bf16.mxu0 %v4508_v56 }
 0x267   :  { %3358 = vmatpush1.bf16.msra.mxu0 %v4482_v63 }
 0x268   :  { %3359 = vmatprep.subr.bf16.mxu0 %v4508_v56 }
 0x26b   :  { %3360 = vmatpush1.bf16.msra.mxu0 %v4483_v0 }
 0x26c   :  { %3373 = vmatprep.subr.bf16.mxu0 %v4508_v56 }
 0x26f   :  { %3374 = vmatpush2.bf16.msra.mxu0 %v3343_v16 }
 0x270   :  { %3375 = vmatprep.subr.bf16.mxu0 %v4508_v56 }
 0x273   :  { %3376 = vmatpush2.bf16.msra.mxu0 %v4485_v58 }
 0x30e   :  { %v3065_v5 = vpop.f32.mrf.mxu0 }
 0x30f   :  { %v3066_v6 = vadd.f32 %v3065_v5, %v2918_v3 }
 0x310   :  { %v3067_v7 = vpop.f32.mrf.mxu0 }
 0x311   :  { %v3068_v8 = vadd.f32 %v3067_v7, %v2922_v4  ;;  %v3072_v9 = vmax.f32 %v3066_v6, 0.0 }
 0x312   :  { %v3069_v10 = vpop.f32.mrf.mxu0 }
 0x313   :  { %v3073_v11 = vmax.f32 %v3068_v8, 0.0  ;;  %v3074_v14 = vpack.c.bf16 %v3072_v9, %v3072_v9 }
 0x314   :  { %v3070_v12 = vpop.f32.mrf.mxu0 }
 0x315   :  { %v3075_v13 = vpack.c.bf16 %v3073_v11, %v3073_v11 }
 0x317   :  { %3827 = vmatprep.mubr.msk.bf16.mxu1 %vm3020_vm1, %v3075_v13 }
 0x318   :  { %3244 = vmatmul.mubr.bf16.vlgmr.msra.gmra.mxu1 %v3074_v14 }
 0x3d8   :  { %v3245_v22 = vpop.f32.mrf.mxu1 }
 0x3d9   :  { %v3246_v23 = vadd.f32 %v3245_v22, %v3100_v19 }
 0x3da   :  { %v3247_v24 = vpop.f32.mrf.mxu1 }
 0x3db   :  { %v3248_v25 = vadd.f32 %v3247_v24, %v3104_v20  ;;  %v3252_v1 = vmax.f32 %v3246_v23, 0.0 }
 0x3dc   :  { %v3249_v26 = vpop.f32.mrf.mxu1 }
 0x3dd   :  { %v3253_v27 = vmax.f32 %v3248_v25, 0.0  ;;  %v3254_v30 = vpack.c.bf16 %v3252_v1, %v3252_v1 }
 0x3de   :  { %v3250_v28 = vpop.f32.mrf.mxu1 }
 0x3df   :  { %v3255_v29 = vpack.c.bf16 %v3253_v27, %v3253_v27 }
 0x3e1   :  { %3839 = vmatprep.mubr.msk.bf16.mxu0 %vm3020_vm1, %v3255_v29 }
 0x3e2   :  { %3378 = vmatmul.mubr.bf16.vlgmr.msra.gmra.mxu0 %v3254_v30 }
 0x4a2   :  { %v3379_v32 = vpop.f32.mrf.mxu0 }
 0x4a3   :  { %v3380_v37 = vadd.f32 %v3828_v31, %v3379_v32 }
 0x4a4   :  { %v3381_v33 = vpop.f32.mrf.mxu0 }
 0x4a5   :  { %3385 = vst [vmem:[#allocation2] sm:$0xff] %v3380_v37 }
 0x4a6   :  { %v3382_v34 = vpop.f32.mrf.mxu0 }
 0x4a7   :  { %4497 = shalt.err (!%p4494_p4)
}
 0x4a8   :  { %3395 = dma.vmem_to_hbm [thread:$0]  %s3393_s0, 128, %s5982_s9, [#allocation3]   ;;  %v3383_v35 = vpop.f32.mrf.mxu0 }
 0x4a9   :  { %4506 = dma.done.wait [#allocation3], 128  }
 0x4aa   :  { %4507 = vsyncadd [#allocation3], 4294967168 }
 0x4ab   :  { %3399 = vsyncpa [#allocation3], 1 }

</bundles_post_ra>
